<compile_context>
chip_gen: v7x
topology: tpu7x:2x2x1
jax: 0.10.0
libtpu: 0.0.40
codegen_flags: <defaults>
</compile_context>

<pallas_src>
import jax
import jax.numpy as jnp
from jax import lax
from jax.experimental import pallas as pl
from jax.experimental.pallas import tpu as pltpu


def _make_kernel(Bt, S, E, H, FF, eps=1e-5):
    """Build the fused encoder-layer kernel for static shapes."""
    DH = E // H
    f32 = jnp.float32
    bf16 = jnp.bfloat16

    def layer_norm(x, w, b):
        mu = jnp.mean(x, axis=-1, keepdims=True)
        xc = x - mu
        var = jnp.mean(xc * xc, axis=-1, keepdims=True)
        return xc * lax.rsqrt(var + eps) * w + b

    def kernel(q_ref, k_ref, v_ref,
               n3w_ref, n3b_ref, n1w_ref, n1b_ref, n2w_ref, n2b_ref,
               wq_ref, bq_ref, wk_ref, bk_ref, wv_ref, bv_ref,
               wo_ref, bo_ref, w1_ref, b1_ref, w2_ref, b2_ref,
               out_ref):
        R = Bt * S

        # --- norm3 on queries / keys / values (flattened rows, f32 math) ---
        n3w, n3b = n3w_ref[...], n3b_ref[...]
        qn = layer_norm(q_ref[...].reshape(R, E), n3w, n3b)
        kn = layer_norm(k_ref[...].reshape(R, E), n3w, n3b)
        vn = layer_norm(v_ref[...].reshape(R, E), n3w, n3b)

        # --- fused lane-dense Q/K/V projections (M=Bt*S, N=K=E) ---
        # 1/sqrt(DH) already folded into wq / bq host-side.
        qp = (jnp.dot(qn.astype(bf16), wq_ref[...],
                      preferred_element_type=f32) + bq_ref[...]).astype(bf16)
        kp = (jnp.dot(kn.astype(bf16), wk_ref[...],
                      preferred_element_type=f32) + bk_ref[...]).astype(bf16)
        vp = (jnp.dot(vn.astype(bf16), wv_ref[...],
                      preferred_element_type=f32) + bv_ref[...]).astype(bf16)

        # --- attention: static (batch, head) unroll; scale the (S,DH) output
        #     rather than the (S,S) probabilities ---
        # TODO(synk): for large S, switch to a KV-tiled online-softmax loop so
        # the f32 (S,S) score tile stays bounded on v7x's 64 MiB VMEM.
        ctx_rows = []
        for b in range(Bt):
            r0 = b * S
            head_outs = []
            for h in range(H):
                c0 = h * DH
                qh = qp[r0:r0 + S, c0:c0 + DH]
                kh = kp[r0:r0 + S, c0:c0 + DH]
                vh = vp[r0:r0 + S, c0:c0 + DH]
                s = lax.dot_general(qh, kh, (((1,), (1,)), ((), ())),
                                    preferred_element_type=f32)        # (S, S)
                s = s - jnp.max(s, axis=-1, keepdims=True)
                p = jnp.exp(s)
                denom = jnp.sum(p, axis=-1, keepdims=True)             # (S, 1)
                o = jnp.dot(p.astype(bf16), vh,
                            preferred_element_type=f32)                # (S, DH)
                head_outs.append(o * pl.reciprocal(denom, approx=True))
            ctx_rows.append(jnp.concatenate(head_outs, axis=-1))        # (S, E)
        ctx = jnp.concatenate(ctx_rows, axis=0)                         # (R, E)

        # --- single full-depth output projection (K=E) ---
        attn = jnp.dot(ctx.astype(bf16), wo_ref[...],
                       preferred_element_type=f32) + bo_ref[...]

        # dropout / dropout1 / dropout2 are identity (eval-mode semantics)
        # residual vs the *normalized* queries, as in the reference module
        src = layer_norm(qn + attn, n1w_ref[...], n1b_ref[...])

        # --- feed-forward (bf16 MXU, f32 accumulation) ---
        h1 = jnp.dot(src.astype(bf16), w1_ref[...],
                     preferred_element_type=f32) + b1_ref[...]
        h1 = jnp.maximum(h1, 0.0)                                       # relu
        h2 = jnp.dot(h1.astype(bf16), w2_ref[...],
                     preferred_element_type=f32) + b2_ref[...]

        # --- residual + norm2 ---
        src = layer_norm(src + h2, n2w_ref[...], n2b_ref[...])
        out_ref[...] = src.reshape(Bt, S, E).astype(out_ref.dtype)

    return kernel


def _pick_block_b(B, S, target_rows=256):
    """Largest divisor of B such that Bt*S stays at/below ~target_rows."""
    bt = 1
    for cand in range(1, B + 1):
        if B % cand == 0 and cand * S <= max(S, target_rows):
            bt = cand
    return bt


def _vmem_limit_bytes():
    """Generation-conditional scoped-VMEM budget."""
    try:
        kind = jax.devices()[0].device_kind.lower()
    except Exception:
        return 48 * 1024 * 1024
    if "v7" in kind:
        return 56 * 1024 * 1024          # 64 MiB physical per TC -> leave headroom
    return 100 * 1024 * 1024             # v4 / v5e / v6e: 128 MiB physical VMEM


def transformer_encoder_layer(q, k, v, params, block_b=None):
    """q, k, v: (seq, batch, dim_model) float32 — PyTorch batch_first=False."""
    S, B, E = q.shape
    H = int(params["nhead"])
    DH = E // H
    FF = params["w1"].shape[1]
    Bt = _pick_block_b(B, S) if block_b is None else block_b
    assert B % Bt == 0 and E % H == 0
    scale = 1.0 / (DH ** 0.5)
    bf16 = jnp.bfloat16
    vmem_limit = _vmem_limit_bytes()

    kernel = _make_kernel(Bt, S, E, H, FF)

    def run(q, k, v, p):
        # Layout change + weight prep live in the same XLA program as the kernel.
        # TODO(synk): read the (S, B, E) layout directly once (S, 1, E) blocks
        # (second-minor block dim 1) lower cleanly; until then transpose here.
        qb = jnp.transpose(q, (1, 0, 2))
        kb = jnp.transpose(k, (1, 0, 2))
        vb = jnp.transpose(v, (1, 0, 2))

        row = lambda x: x.reshape(1, -1).astype(jnp.float32)

        wq = (p["wq"] * scale).astype(bf16)      # fold 1/sqrt(DH) into Wq / bq
        bq = row(p["bq"]) * scale
        wk = p["wk"].astype(bf16)
        wv = p["wv"].astype(bf16)
        wo = p["wo"].astype(bf16)
        w1 = p["w1"].astype(bf16)
        w2 = p["w2"].astype(bf16)

        args = (qb, kb, vb,
                row(p["n3w"]), row(p["n3b"]),
                row(p["n1w"]), row(p["n1b"]),
                row(p["n2w"]), row(p["n2b"]),
                wq, bq, wk, row(p["bk"]), wv, row(p["bv"]),
                wo, row(p["bo"]),
                w1, row(p["b1"]),
                w2, row(p["b2"]))

        tok_spec = pl.BlockSpec((Bt, S, E), lambda i: (i, 0, 0))

        # Constant index_map -> weights stay VMEM-resident across grid steps.
        # TODO(synk): add pipeline_mode=pl.Buffered(1) to weight specs once
        # single-buffered pipeline_mode is validated on this JAX version
        # (reclaims the redundant second weight buffer on v7x's 64 MiB VMEM).
        def res(shp):
            return pl.BlockSpec(shp, lambda i: (0,) * len(shp))

        in_specs = [tok_spec, tok_spec, tok_spec,
                    res((1, E)), res((1, E)), res((1, E)),
                    res((1, E)), res((1, E)), res((1, E)),
                    res((E, E)), res((1, E)),
                    res((E, E)), res((1, E)),
                    res((E, E)), res((1, E)),
                    res((E, E)), res((1, E)),
                    res((E, FF)), res((1, FF)),
                    res((FF, E)), res((1, E))]

        out = pl.pallas_call(
            kernel,
            out_shape=jax.ShapeDtypeStruct((B, S, E), jnp.float32),
            grid=(B // Bt,),
            in_specs=in_specs,
            out_specs=tok_spec,
            compiler_params=pltpu.CompilerParams(
                dimension_semantics=("parallel",),    # megacore sharding on v7x
                vmem_limit_bytes=vmem_limit,
            ),
        )(*args)

        return jnp.transpose(out, (1, 0, 2))          # back to (seq, batch, E)

    arrays = {name: val for name, val in params.items() if name != "nhead"}
    return jax.jit(run)(q, k, v, arrays)


def init_params(key, E, H, FF):
    """Deterministic synthetic parameters mirroring the PyTorch module shapes."""
    def xavier(k, out_dim, in_dim):
        bound = (6.0 / (in_dim + out_dim)) ** 0.5
        return jax.random.uniform(k, (out_dim, in_dim), jnp.float32, -bound, bound)

    ks = jax.random.split(key, 6)
    in_proj = xavier(ks[0], 3 * E, E)           # (3E, E) as in nn.MultiheadAttention
    wq = in_proj[:E].T                          # pre-transposed to (in, out) for x @ W
    wk = in_proj[E:2 * E].T
    wv = in_proj[2 * E:].T
    wo = xavier(ks[1], E, E).T                  # out_proj
    w1 = xavier(ks[2], FF, E).T                 # linear1: (E, FF)
    w2 = xavier(ks[3], E, FF).T                 # linear2: (FF, E)

    bq = jnp.zeros((E,), jnp.float32)           # in_proj_bias is zero-initialised
    bk = jnp.zeros((E,), jnp.float32)
    bv = jnp.zeros((E,), jnp.float32)
    bo = jnp.zeros((E,), jnp.float32)
    b1 = 0.01 * jax.random.normal(ks[4], (FF,), jnp.float32)
    b2 = 0.01 * jax.random.normal(ks[5], (E,), jnp.float32)

    ones, zeros = jnp.ones((E,), jnp.float32), jnp.zeros((E,), jnp.float32)
    return dict(nhead=H,
                wq=wq, wk=wk, wv=wv, wo=wo, w1=w1, w2=w2,
                bq=bq, bk=bk, bv=bv, bo=bo, b1=b1, b2=b2,
                n1w=ones, n1b=zeros, n2w=ones, n2b=zeros, n3w=ones, n3b=zeros)


if __name__ == "__main__":
    S, B, E, H, FF = 8, 2, 32, 4, 64  # seq, batch, dim_model, nhead, dim_feedforward
    # TODO(synk): E=32 (< 128 lanes) wastes vreg width; pad E/DH to 128-multiples
    # for real shapes so stores are unmasked and the MXU tiles are full.

    key = jax.random.PRNGKey(0)
    kq, kk, kv, kp = jax.random.split(key, 4)
    q = jax.random.normal(kq, (S, B, E), jnp.float32)
    k = jax.random.normal(kk, (S, B, E), jnp.float32)
    v = jax.random.normal(kv, (S, B, E), jnp.float32)

    params = init_params(kp, E, H, FF)

    out = transformer_encoder_layer(q, k, v, params)
    jax.block_until_ready(out)
    assert out.shape == (S, B, E)
    print("KERNEL_OK")
</pallas_src>

<mosaic_0001>
module attributes {stable_mosaic.version = 11 : i64} {
  func.func @kernel(%arg0: i32, %arg1: memref<2x8x32xf32, #tpu.memory_space<vmem>>, %arg2: memref<2x8x32xf32, #tpu.memory_space<vmem>>, %arg3: memref<2x8x32xf32, #tpu.memory_space<vmem>>, %arg4: memref<1x32xf32, #tpu.memory_space<vmem>>, %arg5: memref<1x32xf32, #tpu.memory_space<vmem>>, %arg6: memref<1x32xf32, #tpu.memory_space<vmem>>, %arg7: memref<1x32xf32, #tpu.memory_space<vmem>>, %arg8: memref<1x32xf32, #tpu.memory_space<vmem>>, %arg9: memref<1x32xf32, #tpu.memory_space<vmem>>, %arg10: memref<32x32xbf16, #tpu.memory_space<vmem>>, %arg11: memref<1x32xf32, #tpu.memory_space<vmem>>, %arg12: memref<32x32xbf16, #tpu.memory_space<vmem>>, %arg13: memref<1x32xf32, #tpu.memory_space<vmem>>, %arg14: memref<32x32xbf16, #tpu.memory_space<vmem>>, %arg15: memref<1x32xf32, #tpu.memory_space<vmem>>, %arg16: memref<32x32xbf16, #tpu.memory_space<vmem>>, %arg17: memref<1x32xf32, #tpu.memory_space<vmem>>, %arg18: memref<32x64xbf16, #tpu.memory_space<vmem>>, %arg19: memref<1x64xf32, #tpu.memory_space<vmem>>, %arg20: memref<64x32xbf16, #tpu.memory_space<vmem>>, %arg21: memref<1x32xf32, #tpu.memory_space<vmem>>, %arg22: memref<2x8x32xf32, #tpu.memory_space<vmem>>) attributes {dimension_semantics = [#tpu.dimension_semantics<parallel>], iteration_bounds = array<i64: 1>, scalar_prefetch = 0 : i64, scratch_operands = 0 : i64, tpu.core_type = #tpu.core_type<tc>, window_params = [{transform_indices = @transform_0, window_bounds = array<i64: 2, 8, 32>}, {transform_indices = @transform_1, window_bounds = array<i64: 2, 8, 32>}, {transform_indices = @transform_2, window_bounds = array<i64: 2, 8, 32>}, {pipeline_mode = #tpu.pipeline_mode<synchronous>, transform_indices = @transform_3, window_bounds = array<i64: 1, 32>}, {pipeline_mode = #tpu.pipeline_mode<synchronous>, transform_indices = @transform_4, window_bounds = array<i64: 1, 32>}, {pipeline_mode = #tpu.pipeline_mode<synchronous>, transform_indices = @transform_5, window_bounds = array<i64: 1, 32>}, {pipeline_mode = #tpu.pipeline_mode<synchronous>, transform_indices = @transform_6, window_bounds = array<i64: 1, 32>}, {pipeline_mode = #tpu.pipeline_mode<synchronous>, transform_indices = @transform_7, window_bounds = array<i64: 1, 32>}, {pipeline_mode = #tpu.pipeline_mode<synchronous>, transform_indices = @transform_8, window_bounds = array<i64: 1, 32>}, {pipeline_mode = #tpu.pipeline_mode<synchronous>, transform_indices = @transform_9, window_bounds = array<i64: 32, 32>}, {pipeline_mode = #tpu.pipeline_mode<synchronous>, transform_indices = @transform_10, window_bounds = array<i64: 1, 32>}, {pipeline_mode = #tpu.pipeline_mode<synchronous>, transform_indices = @transform_11, window_bounds = array<i64: 32, 32>}, {pipeline_mode = #tpu.pipeline_mode<synchronous>, transform_indices = @transform_12, window_bounds = array<i64: 1, 32>}, {pipeline_mode = #tpu.pipeline_mode<synchronous>, transform_indices = @transform_13, window_bounds = array<i64: 32, 32>}, {pipeline_mode = #tpu.pipeline_mode<synchronous>, transform_indices = @transform_14, window_bounds = array<i64: 1, 32>}, {pipeline_mode = #tpu.pipeline_mode<synchronous>, transform_indices = @transform_15, window_bounds = array<i64: 32, 32>}, {pipeline_mode = #tpu.pipeline_mode<synchronous>, transform_indices = @transform_16, window_bounds = array<i64: 1, 32>}, {pipeline_mode = #tpu.pipeline_mode<synchronous>, transform_indices = @transform_17, window_bounds = array<i64: 32, 64>}, {pipeline_mode = #tpu.pipeline_mode<synchronous>, transform_indices = @transform_18, window_bounds = array<i64: 1, 64>}, {pipeline_mode = #tpu.pipeline_mode<synchronous>, transform_indices = @transform_19, window_bounds = array<i64: 64, 32>}, {pipeline_mode = #tpu.pipeline_mode<synchronous>, transform_indices = @transform_20, window_bounds = array<i64: 1, 32>}, {transform_indices = @transform_21, window_bounds = array<i64: 2, 8, 32>}]} {
    %c0 = arith.constant 0 : index
    %c0_0 = arith.constant 0 : index
    %0 = vector.load %arg4[%c0, %c0_0] : memref<1x32xf32, #tpu.memory_space<vmem>>, vector<1x32xf32>
    %c0_1 = arith.constant 0 : index
    %c0_2 = arith.constant 0 : index
    %1 = vector.load %arg5[%c0_1, %c0_2] : memref<1x32xf32, #tpu.memory_space<vmem>>, vector<1x32xf32>
    %c0_3 = arith.constant 0 : index
    %c0_4 = arith.constant 0 : index
    %c0_5 = arith.constant 0 : index
    %2 = vector.load %arg1[%c0_3, %c0_4, %c0_5] : memref<2x8x32xf32, #tpu.memory_space<vmem>>, vector<2x8x32xf32>
    %3 = vector.shape_cast %2 : vector<2x8x32xf32> to vector<16x32xf32>
    %cst = arith.constant dense<0.000000e+00> : vector<16xf32>
    %4 = vector.multi_reduction <add>, %3, %cst [1] : vector<16x32xf32> to vector<16xf32>
    %5 = vector.shape_cast %4 : vector<16xf32> to vector<16x1xf32>
    %cst_6 = arith.constant 3.200000e+01 : f32
    %6 = vector.broadcast %cst_6 : f32 to vector<16x1xf32>
    %7 = arith.divf %5, %6 : vector<16x1xf32>
    %8 = vector.broadcast %7 : vector<16x1xf32> to vector<16x32xf32>
    %9 = arith.subf %3, %8 : vector<16x32xf32>
    %10 = arith.mulf %9, %9 : vector<16x32xf32>
    %cst_7 = arith.constant dense<0.000000e+00> : vector<16xf32>
    %11 = vector.multi_reduction <add>, %10, %cst_7 [1] : vector<16x32xf32> to vector<16xf32>
    %12 = vector.shape_cast %11 : vector<16xf32> to vector<16x1xf32>
    %cst_8 = arith.constant 3.200000e+01 : f32
    %13 = vector.broadcast %cst_8 : f32 to vector<16x1xf32>
    %14 = arith.divf %12, %13 : vector<16x1xf32>
    %cst_9 = arith.constant 9.99999974E-6 : f32
    %15 = vector.broadcast %cst_9 : f32 to vector<16x1xf32>
    %16 = arith.addf %14, %15 : vector<16x1xf32>
    %17 = math.rsqrt %16 : vector<16x1xf32>
    %18 = vector.broadcast %17 : vector<16x1xf32> to vector<16x32xf32>
    %19 = arith.mulf %9, %18 : vector<16x32xf32>
    %20 = vector.broadcast %0 : vector<1x32xf32> to vector<16x32xf32>
    %21 = arith.mulf %19, %20 : vector<16x32xf32>
    %22 = vector.broadcast %1 : vector<1x32xf32> to vector<16x32xf32>
    %23 = arith.addf %21, %22 : vector<16x32xf32>
    %c0_10 = arith.constant 0 : index
    %c0_11 = arith.constant 0 : index
    %c0_12 = arith.constant 0 : index
    %24 = vector.load %arg2[%c0_10, %c0_11, %c0_12] : memref<2x8x32xf32, #tpu.memory_space<vmem>>, vector<2x8x32xf32>
    %25 = vector.shape_cast %24 : vector<2x8x32xf32> to vector<16x32xf32>
    %cst_13 = arith.constant dense<0.000000e+00> : vector<16xf32>
    %26 = vector.multi_reduction <add>, %25, %cst_13 [1] : vector<16x32xf32> to vector<16xf32>
    %27 = vector.shape_cast %26 : vector<16xf32> to vector<16x1xf32>
    %cst_14 = arith.constant 3.200000e+01 : f32
    %28 = vector.broadcast %cst_14 : f32 to vector<16x1xf32>
    %29 = arith.divf %27, %28 : vector<16x1xf32>
    %30 = vector.broadcast %29 : vector<16x1xf32> to vector<16x32xf32>
    %31 = arith.subf %25, %30 : vector<16x32xf32>
    %32 = arith.mulf %31, %31 : vector<16x32xf32>
    %cst_15 = arith.constant dense<0.000000e+00> : vector<16xf32>
    %33 = vector.multi_reduction <add>, %32, %cst_15 [1] : vector<16x32xf32> to vector<16xf32>
    %34 = vector.shape_cast %33 : vector<16xf32> to vector<16x1xf32>
    %cst_16 = arith.constant 3.200000e+01 : f32
    %35 = vector.broadcast %cst_16 : f32 to vector<16x1xf32>
    %36 = arith.divf %34, %35 : vector<16x1xf32>
    %cst_17 = arith.constant 9.99999974E-6 : f32
    %37 = vector.broadcast %cst_17 : f32 to vector<16x1xf32>
    %38 = arith.addf %36, %37 : vector<16x1xf32>
    %39 = math.rsqrt %38 : vector<16x1xf32>
    %40 = vector.broadcast %39 : vector<16x1xf32> to vector<16x32xf32>
    %41 = arith.mulf %31, %40 : vector<16x32xf32>
    %42 = vector.broadcast %0 : vector<1x32xf32> to vector<16x32xf32>
    %43 = arith.mulf %41, %42 : vector<16x32xf32>
    %44 = vector.broadcast %1 : vector<1x32xf32> to vector<16x32xf32>
    %45 = arith.addf %43, %44 : vector<16x32xf32>
    %c0_18 = arith.constant 0 : index
    %c0_19 = arith.constant 0 : index
    %c0_20 = arith.constant 0 : index
    %46 = vector.load %arg3[%c0_18, %c0_19, %c0_20] : memref<2x8x32xf32, #tpu.memory_space<vmem>>, vector<2x8x32xf32>
    %47 = vector.shape_cast %46 : vector<2x8x32xf32> to vector<16x32xf32>
    %cst_21 = arith.constant dense<0.000000e+00> : vector<16xf32>
    %48 = vector.multi_reduction <add>, %47, %cst_21 [1] : vector<16x32xf32> to vector<16xf32>
    %49 = vector.shape_cast %48 : vector<16xf32> to vector<16x1xf32>
    %cst_22 = arith.constant 3.200000e+01 : f32
    %50 = vector.broadcast %cst_22 : f32 to vector<16x1xf32>
    %51 = arith.divf %49, %50 : vector<16x1xf32>
    %52 = vector.broadcast %51 : vector<16x1xf32> to vector<16x32xf32>
    %53 = arith.subf %47, %52 : vector<16x32xf32>
    %54 = arith.mulf %53, %53 : vector<16x32xf32>
    %cst_23 = arith.constant dense<0.000000e+00> : vector<16xf32>
    %55 = vector.multi_reduction <add>, %54, %cst_23 [1] : vector<16x32xf32> to vector<16xf32>
    %56 = vector.shape_cast %55 : vector<16xf32> to vector<16x1xf32>
    %cst_24 = arith.constant 3.200000e+01 : f32
    %57 = vector.broadcast %cst_24 : f32 to vector<16x1xf32>
    %58 = arith.divf %56, %57 : vector<16x1xf32>
    %cst_25 = arith.constant 9.99999974E-6 : f32
    %59 = vector.broadcast %cst_25 : f32 to vector<16x1xf32>
    %60 = arith.addf %58, %59 : vector<16x1xf32>
    %61 = math.rsqrt %60 : vector<16x1xf32>
    %62 = vector.broadcast %61 : vector<16x1xf32> to vector<16x32xf32>
    %63 = arith.mulf %53, %62 : vector<16x32xf32>
    %64 = vector.broadcast %0 : vector<1x32xf32> to vector<16x32xf32>
    %65 = arith.mulf %63, %64 : vector<16x32xf32>
    %66 = vector.broadcast %1 : vector<1x32xf32> to vector<16x32xf32>
    %67 = arith.addf %65, %66 : vector<16x32xf32>
    %68 = arith.truncf %23 : vector<16x32xf32> to vector<16x32xbf16>
    %c0_26 = arith.constant 0 : index
    %c0_27 = arith.constant 0 : index
    %69 = vector.load %arg10[%c0_26, %c0_27] : memref<32x32xbf16, #tpu.memory_space<vmem>>, vector<32x32xbf16>
    %cst_28 = arith.constant dense<0.000000e+00> : vector<16x32xf32>
    %70 = tpu.matmul %68, %69, %cst_28 {dimension_numbers = #tpu.dot_dimension_numbers<[1], [0], [0], [1], [0, 0, 1, 1], [], []>} : vector<16x32xbf16>, vector<32x32xbf16>, vector<16x32xf32> -> vector<16x32xf32>
    %c0_29 = arith.constant 0 : index
    %c0_30 = arith.constant 0 : index
    %71 = vector.load %arg11[%c0_29, %c0_30] : memref<1x32xf32, #tpu.memory_space<vmem>>, vector<1x32xf32>
    %72 = vector.broadcast %71 : vector<1x32xf32> to vector<16x32xf32>
    %73 = arith.addf %70, %72 : vector<16x32xf32>
    %74 = arith.truncf %73 : vector<16x32xf32> to vector<16x32xbf16>
    %75 = arith.truncf %45 : vector<16x32xf32> to vector<16x32xbf16>
    %c0_31 = arith.constant 0 : index
    %c0_32 = arith.constant 0 : index
    %76 = vector.load %arg12[%c0_31, %c0_32] : memref<32x32xbf16, #tpu.memory_space<vmem>>, vector<32x32xbf16>
    %cst_33 = arith.constant dense<0.000000e+00> : vector<16x32xf32>
    %77 = tpu.matmul %75, %76, %cst_33 {dimension_numbers = #tpu.dot_dimension_numbers<[1], [0], [0], [1], [0, 0, 1, 1], [], []>} : vector<16x32xbf16>, vector<32x32xbf16>, vector<16x32xf32> -> vector<16x32xf32>
    %c0_34 = arith.constant 0 : index
    %c0_35 = arith.constant 0 : index
    %78 = vector.load %arg13[%c0_34, %c0_35] : memref<1x32xf32, #tpu.memory_space<vmem>>, vector<1x32xf32>
    %79 = vector.broadcast %78 : vector<1x32xf32> to vector<16x32xf32>
    %80 = arith.addf %77, %79 : vector<16x32xf32>
    %81 = arith.truncf %80 : vector<16x32xf32> to vector<16x32xbf16>
    %82 = arith.truncf %67 : vector<16x32xf32> to vector<16x32xbf16>
    %c0_36 = arith.constant 0 : index
    %c0_37 = arith.constant 0 : index
    %83 = vector.load %arg14[%c0_36, %c0_37] : memref<32x32xbf16, #tpu.memory_space<vmem>>, vector<32x32xbf16>
    %cst_38 = arith.constant dense<0.000000e+00> : vector<16x32xf32>
    %84 = tpu.matmul %82, %83, %cst_38 {dimension_numbers = #tpu.dot_dimension_numbers<[1], [0], [0], [1], [0, 0, 1, 1], [], []>} : vector<16x32xbf16>, vector<32x32xbf16>, vector<16x32xf32> -> vector<16x32xf32>
    %c0_39 = arith.constant 0 : index
    %c0_40 = arith.constant 0 : index
    %85 = vector.load %arg15[%c0_39, %c0_40] : memref<1x32xf32, #tpu.memory_space<vmem>>, vector<1x32xf32>
    %86 = vector.broadcast %85 : vector<1x32xf32> to vector<16x32xf32>
    %87 = arith.addf %84, %86 : vector<16x32xf32>
    %88 = arith.truncf %87 : vector<16x32xf32> to vector<16x32xbf16>
    %89 = vector.extract_strided_slice %74 {offsets = [0, 0], sizes = [8, 8], strides = [1, 1]} : vector<16x32xbf16> to vector<8x8xbf16>
    %90 = vector.extract_strided_slice %81 {offsets = [0, 0], sizes = [8, 8], strides = [1, 1]} : vector<16x32xbf16> to vector<8x8xbf16>
    %91 = vector.extract_strided_slice %88 {offsets = [0, 0], sizes = [8, 8], strides = [1, 1]} : vector<16x32xbf16> to vector<8x8xbf16>
    %cst_41 = arith.constant dense<0.000000e+00> : vector<8x8xf32>
    %92 = tpu.matmul %89, %90, %cst_41 {dimension_numbers = #tpu.dot_dimension_numbers<[1], [1], [0], [0], [0, 0, 1, 0], [], []>} : vector<8x8xbf16>, vector<8x8xbf16>, vector<8x8xf32> -> vector<8x8xf32>
    %cst_42 = arith.constant dense<0xFF800000> : vector<8xf32>
    %93 = vector.multi_reduction <maximumf>, %92, %cst_42 [1] : vector<8x8xf32> to vector<8xf32>
    %94 = vector.shape_cast %93 : vector<8xf32> to vector<8x1xf32>
    %95 = vector.broadcast %94 : vector<8x1xf32> to vector<8x8xf32>
    %96 = arith.subf %92, %95 : vector<8x8xf32>
    %97 = math.exp %96 : vector<8x8xf32>
    %cst_43 = arith.constant dense<0.000000e+00> : vector<8xf32>
    %98 = vector.multi_reduction <add>, %97, %cst_43 [1] : vector<8x8xf32> to vector<8xf32>
    %99 = vector.shape_cast %98 : vector<8xf32> to vector<8x1xf32>
    %100 = arith.truncf %97 : vector<8x8xf32> to vector<8x8xbf16>
    %cst_44 = arith.constant dense<0.000000e+00> : vector<8x8xf32>
    %101 = tpu.matmul %100, %91, %cst_44 {dimension_numbers = #tpu.dot_dimension_numbers<[1], [0], [0], [1], [0, 0, 1, 1], [], []>} : vector<8x8xbf16>, vector<8x8xbf16>, vector<8x8xf32> -> vector<8x8xf32>
    %102 = tpu.reciprocal %99 {approx = true} : vector<8x1xf32> -> vector<8x1xf32>
    %103 = vector.broadcast %102 : vector<8x1xf32> to vector<8x8xf32>
    %104 = arith.mulf %101, %103 : vector<8x8xf32>
    %105 = vector.extract_strided_slice %74 {offsets = [0, 8], sizes = [8, 8], strides = [1, 1]} : vector<16x32xbf16> to vector<8x8xbf16>
    %106 = vector.extract_strided_slice %81 {offsets = [0, 8], sizes = [8, 8], strides = [1, 1]} : vector<16x32xbf16> to vector<8x8xbf16>
    %107 = vector.extract_strided_slice %88 {offsets = [0, 8], sizes = [8, 8], strides = [1, 1]} : vector<16x32xbf16> to vector<8x8xbf16>
    %cst_45 = arith.constant dense<0.000000e+00> : vector<8x8xf32>
    %108 = tpu.matmul %105, %106, %cst_45 {dimension_numbers = #tpu.dot_dimension_numbers<[1], [1], [0], [0], [0, 0, 1, 0], [], []>} : vector<8x8xbf16>, vector<8x8xbf16>, vector<8x8xf32> -> vector<8x8xf32>
    %cst_46 = arith.constant dense<0xFF800000> : vector<8xf32>
    %109 = vector.multi_reduction <maximumf>, %108, %cst_46 [1] : vector<8x8xf32> to vector<8xf32>
    %110 = vector.shape_cast %109 : vector<8xf32> to vector<8x1xf32>
    %111 = vector.broadcast %110 : vector<8x1xf32> to vector<8x8xf32>
    %112 = arith.subf %108, %111 : vector<8x8xf32>
    %113 = math.exp %112 : vector<8x8xf32>
    %cst_47 = arith.constant dense<0.000000e+00> : vector<8xf32>
    %114 = vector.multi_reduction <add>, %113, %cst_47 [1] : vector<8x8xf32> to vector<8xf32>
    %115 = vector.shape_cast %114 : vector<8xf32> to vector<8x1xf32>
    %116 = arith.truncf %113 : vector<8x8xf32> to vector<8x8xbf16>
    %cst_48 = arith.constant dense<0.000000e+00> : vector<8x8xf32>
    %117 = tpu.matmul %116, %107, %cst_48 {dimension_numbers = #tpu.dot_dimension_numbers<[1], [0], [0], [1], [0, 0, 1, 1], [], []>} : vector<8x8xbf16>, vector<8x8xbf16>, vector<8x8xf32> -> vector<8x8xf32>
    %118 = tpu.reciprocal %115 {approx = true} : vector<8x1xf32> -> vector<8x1xf32>
    %119 = vector.broadcast %118 : vector<8x1xf32> to vector<8x8xf32>
    %120 = arith.mulf %117, %119 : vector<8x8xf32>
    %121 = vector.extract_strided_slice %74 {offsets = [0, 16], sizes = [8, 8], strides = [1, 1]} : vector<16x32xbf16> to vector<8x8xbf16>
    %122 = vector.extract_strided_slice %81 {offsets = [0, 16], sizes = [8, 8], strides = [1, 1]} : vector<16x32xbf16> to vector<8x8xbf16>
    %123 = vector.extract_strided_slice %88 {offsets = [0, 16], sizes = [8, 8], strides = [1, 1]} : vector<16x32xbf16> to vector<8x8xbf16>
    %cst_49 = arith.constant dense<0.000000e+00> : vector<8x8xf32>
    %124 = tpu.matmul %121, %122, %cst_49 {dimension_numbers = #tpu.dot_dimension_numbers<[1], [1], [0], [0], [0, 0, 1, 0], [], []>} : vector<8x8xbf16>, vector<8x8xbf16>, vector<8x8xf32> -> vector<8x8xf32>
    %cst_50 = arith.constant dense<0xFF800000> : vector<8xf32>
    %125 = vector.multi_reduction <maximumf>, %124, %cst_50 [1] : vector<8x8xf32> to vector<8xf32>
    %126 = vector.shape_cast %125 : vector<8xf32> to vector<8x1xf32>
    %127 = vector.broadcast %126 : vector<8x1xf32> to vector<8x8xf32>
    %128 = arith.subf %124, %127 : vector<8x8xf32>
    %129 = math.exp %128 : vector<8x8xf32>
    %cst_51 = arith.constant dense<0.000000e+00> : vector<8xf32>
    %130 = vector.multi_reduction <add>, %129, %cst_51 [1] : vector<8x8xf32> to vector<8xf32>
    %131 = vector.shape_cast %130 : vector<8xf32> to vector<8x1xf32>
    %132 = arith.truncf %129 : vector<8x8xf32> to vector<8x8xbf16>
    %cst_52 = arith.constant dense<0.000000e+00> : vector<8x8xf32>
    %133 = tpu.matmul %132, %123, %cst_52 {dimension_numbers = #tpu.dot_dimension_numbers<[1], [0], [0], [1], [0, 0, 1, 1], [], []>} : vector<8x8xbf16>, vector<8x8xbf16>, vector<8x8xf32> -> vector<8x8xf32>
    %134 = tpu.reciprocal %131 {approx = true} : vector<8x1xf32> -> vector<8x1xf32>
    %135 = vector.broadcast %134 : vector<8x1xf32> to vector<8x8xf32>
    %136 = arith.mulf %133, %135 : vector<8x8xf32>
    %137 = vector.extract_strided_slice %74 {offsets = [0, 24], sizes = [8, 8], strides = [1, 1]} : vector<16x32xbf16> to vector<8x8xbf16>
    %138 = vector.extract_strided_slice %81 {offsets = [0, 24], sizes = [8, 8], strides = [1, 1]} : vector<16x32xbf16> to vector<8x8xbf16>
    %139 = vector.extract_strided_slice %88 {offsets = [0, 24], sizes = [8, 8], strides = [1, 1]} : vector<16x32xbf16> to vector<8x8xbf16>
    %cst_53 = arith.constant dense<0.000000e+00> : vector<8x8xf32>
    %140 = tpu.matmul %137, %138, %cst_53 {dimension_numbers = #tpu.dot_dimension_numbers<[1], [1], [0], [0], [0, 0, 1, 0], [], []>} : vector<8x8xbf16>, vector<8x8xbf16>, vector<8x8xf32> -> vector<8x8xf32>
    %cst_54 = arith.constant dense<0xFF800000> : vector<8xf32>
    %141 = vector.multi_reduction <maximumf>, %140, %cst_54 [1] : vector<8x8xf32> to vector<8xf32>
    %142 = vector.shape_cast %141 : vector<8xf32> to vector<8x1xf32>
    %143 = vector.broadcast %142 : vector<8x1xf32> to vector<8x8xf32>
    %144 = arith.subf %140, %143 : vector<8x8xf32>
    %145 = math.exp %144 : vector<8x8xf32>
    %cst_55 = arith.constant dense<0.000000e+00> : vector<8xf32>
    %146 = vector.multi_reduction <add>, %145, %cst_55 [1] : vector<8x8xf32> to vector<8xf32>
    %147 = vector.shape_cast %146 : vector<8xf32> to vector<8x1xf32>
    %148 = arith.truncf %145 : vector<8x8xf32> to vector<8x8xbf16>
    %cst_56 = arith.constant dense<0.000000e+00> : vector<8x8xf32>
    %149 = tpu.matmul %148, %139, %cst_56 {dimension_numbers = #tpu.dot_dimension_numbers<[1], [0], [0], [1], [0, 0, 1, 1], [], []>} : vector<8x8xbf16>, vector<8x8xbf16>, vector<8x8xf32> -> vector<8x8xf32>
    %150 = tpu.reciprocal %147 {approx = true} : vector<8x1xf32> -> vector<8x1xf32>
    %151 = vector.broadcast %150 : vector<8x1xf32> to vector<8x8xf32>
    %152 = arith.mulf %149, %151 : vector<8x8xf32>
    %153 = tpu.concatenate %104, %120, %136, %152 in 1 : vector<8x8xf32>, vector<8x8xf32>, vector<8x8xf32>, vector<8x8xf32> -> vector<8x32xf32>
    %154 = vector.extract_strided_slice %74 {offsets = [8, 0], sizes = [8, 8], strides = [1, 1]} : vector<16x32xbf16> to vector<8x8xbf16>
    %155 = vector.extract_strided_slice %81 {offsets = [8, 0], sizes = [8, 8], strides = [1, 1]} : vector<16x32xbf16> to vector<8x8xbf16>
    %156 = vector.extract_strided_slice %88 {offsets = [8, 0], sizes = [8, 8], strides = [1, 1]} : vector<16x32xbf16> to vector<8x8xbf16>
    %cst_57 = arith.constant dense<0.000000e+00> : vector<8x8xf32>
    %157 = tpu.matmul %154, %155, %cst_57 {dimension_numbers = #tpu.dot_dimension_numbers<[1], [1], [0], [0], [0, 0, 1, 0], [], []>} : vector<8x8xbf16>, vector<8x8xbf16>, vector<8x8xf32> -> vector<8x8xf32>
    %cst_58 = arith.constant dense<0xFF800000> : vector<8xf32>
    %158 = vector.multi_reduction <maximumf>, %157, %cst_58 [1] : vector<8x8xf32> to vector<8xf32>
    %159 = vector.shape_cast %158 : vector<8xf32> to vector<8x1xf32>
    %160 = vector.broadcast %159 : vector<8x1xf32> to vector<8x8xf32>
    %161 = arith.subf %157, %160 : vector<8x8xf32>
    %162 = math.exp %161 : vector<8x8xf32>
    %cst_59 = arith.constant dense<0.000000e+00> : vector<8xf32>
    %163 = vector.multi_reduction <add>, %162, %cst_59 [1] : vector<8x8xf32> to vector<8xf32>
    %164 = vector.shape_cast %163 : vector<8xf32> to vector<8x1xf32>
    %165 = arith.truncf %162 : vector<8x8xf32> to vector<8x8xbf16>
    %cst_60 = arith.constant dense<0.000000e+00> : vector<8x8xf32>
    %166 = tpu.matmul %165, %156, %cst_60 {dimension_numbers = #tpu.dot_dimension_numbers<[1], [0], [0], [1], [0, 0, 1, 1], [], []>} : vector<8x8xbf16>, vector<8x8xbf16>, vector<8x8xf32> -> vector<8x8xf32>
    %167 = tpu.reciprocal %164 {approx = true} : vector<8x1xf32> -> vector<8x1xf32>
    %168 = vector.broadcast %167 : vector<8x1xf32> to vector<8x8xf32>
    %169 = arith.mulf %166, %168 : vector<8x8xf32>
    %170 = vector.extract_strided_slice %74 {offsets = [8, 8], sizes = [8, 8], strides = [1, 1]} : vector<16x32xbf16> to vector<8x8xbf16>
    %171 = vector.extract_strided_slice %81 {offsets = [8, 8], sizes = [8, 8], strides = [1, 1]} : vector<16x32xbf16> to vector<8x8xbf16>
    %172 = vector.extract_strided_slice %88 {offsets = [8, 8], sizes = [8, 8], strides = [1, 1]} : vector<16x32xbf16> to vector<8x8xbf16>
    %cst_61 = arith.constant dense<0.000000e+00> : vector<8x8xf32>
    %173 = tpu.matmul %170, %171, %cst_61 {dimension_numbers = #tpu.dot_dimension_numbers<[1], [1], [0], [0], [0, 0, 1, 0], [], []>} : vector<8x8xbf16>, vector<8x8xbf16>, vector<8x8xf32> -> vector<8x8xf32>
    %cst_62 = arith.constant dense<0xFF800000> : vector<8xf32>
    %174 = vector.multi_reduction <maximumf>, %173, %cst_62 [1] : vector<8x8xf32> to vector<8xf32>
    %175 = vector.shape_cast %174 : vector<8xf32> to vector<8x1xf32>
    %176 = vector.broadcast %175 : vector<8x1xf32> to vector<8x8xf32>
    %177 = arith.subf %173, %176 : vector<8x8xf32>
    %178 = math.exp %177 : vector<8x8xf32>
    %cst_63 = arith.constant dense<0.000000e+00> : vector<8xf32>
    %179 = vector.multi_reduction <add>, %178, %cst_63 [1] : vector<8x8xf32> to vector<8xf32>
    %180 = vector.shape_cast %179 : vector<8xf32> to vector<8x1xf32>
    %181 = arith.truncf %178 : vector<8x8xf32> to vector<8x8xbf16>
    %cst_64 = arith.constant dense<0.000000e+00> : vector<8x8xf32>
    %182 = tpu.matmul %181, %172, %cst_64 {dimension_numbers = #tpu.dot_dimension_numbers<[1], [0], [0], [1], [0, 0, 1, 1], [], []>} : vector<8x8xbf16>, vector<8x8xbf16>, vector<8x8xf32> -> vector<8x8xf32>
    %183 = tpu.reciprocal %180 {approx = true} : vector<8x1xf32> -> vector<8x1xf32>
    %184 = vector.broadcast %183 : vector<8x1xf32> to vector<8x8xf32>
    %185 = arith.mulf %182, %184 : vector<8x8xf32>
    %186 = vector.extract_strided_slice %74 {offsets = [8, 16], sizes = [8, 8], strides = [1, 1]} : vector<16x32xbf16> to vector<8x8xbf16>
    %187 = vector.extract_strided_slice %81 {offsets = [8, 16], sizes = [8, 8], strides = [1, 1]} : vector<16x32xbf16> to vector<8x8xbf16>
    %188 = vector.extract_strided_slice %88 {offsets = [8, 16], sizes = [8, 8], strides = [1, 1]} : vector<16x32xbf16> to vector<8x8xbf16>
    %cst_65 = arith.constant dense<0.000000e+00> : vector<8x8xf32>
    %189 = tpu.matmul %186, %187, %cst_65 {dimension_numbers = #tpu.dot_dimension_numbers<[1], [1], [0], [0], [0, 0, 1, 0], [], []>} : vector<8x8xbf16>, vector<8x8xbf16>, vector<8x8xf32> -> vector<8x8xf32>
    %cst_66 = arith.constant dense<0xFF800000> : vector<8xf32>
    %190 = vector.multi_reduction <maximumf>, %189, %cst_66 [1] : vector<8x8xf32> to vector<8xf32>
    %191 = vector.shape_cast %190 : vector<8xf32> to vector<8x1xf32>
    %192 = vector.broadcast %191 : vector<8x1xf32> to vector<8x8xf32>
    %193 = arith.subf %189, %192 : vector<8x8xf32>
    %194 = math.exp %193 : vector<8x8xf32>
    %cst_67 = arith.constant dense<0.000000e+00> : vector<8xf32>
    %195 = vector.multi_reduction <add>, %194, %cst_67 [1] : vector<8x8xf32> to vector<8xf32>
    %196 = vector.shape_cast %195 : vector<8xf32> to vector<8x1xf32>
    %197 = arith.truncf %194 : vector<8x8xf32> to vector<8x8xbf16>
    %cst_68 = arith.constant dense<0.000000e+00> : vector<8x8xf32>
    %198 = tpu.matmul %197, %188, %cst_68 {dimension_numbers = #tpu.dot_dimension_numbers<[1], [0], [0], [1], [0, 0, 1, 1], [], []>} : vector<8x8xbf16>, vector<8x8xbf16>, vector<8x8xf32> -> vector<8x8xf32>
    %199 = tpu.reciprocal %196 {approx = true} : vector<8x1xf32> -> vector<8x1xf32>
    %200 = vector.broadcast %199 : vector<8x1xf32> to vector<8x8xf32>
    %201 = arith.mulf %198, %200 : vector<8x8xf32>
    %202 = vector.extract_strided_slice %74 {offsets = [8, 24], sizes = [8, 8], strides = [1, 1]} : vector<16x32xbf16> to vector<8x8xbf16>
    %203 = vector.extract_strided_slice %81 {offsets = [8, 24], sizes = [8, 8], strides = [1, 1]} : vector<16x32xbf16> to vector<8x8xbf16>
    %204 = vector.extract_strided_slice %88 {offsets = [8, 24], sizes = [8, 8], strides = [1, 1]} : vector<16x32xbf16> to vector<8x8xbf16>
    %cst_69 = arith.constant dense<0.000000e+00> : vector<8x8xf32>
    %205 = tpu.matmul %202, %203, %cst_69 {dimension_numbers = #tpu.dot_dimension_numbers<[1], [1], [0], [0], [0, 0, 1, 0], [], []>} : vector<8x8xbf16>, vector<8x8xbf16>, vector<8x8xf32> -> vector<8x8xf32>
    %cst_70 = arith.constant dense<0xFF800000> : vector<8xf32>
    %206 = vector.multi_reduction <maximumf>, %205, %cst_70 [1] : vector<8x8xf32> to vector<8xf32>
    %207 = vector.shape_cast %206 : vector<8xf32> to vector<8x1xf32>
    %208 = vector.broadcast %207 : vector<8x1xf32> to vector<8x8xf32>
    %209 = arith.subf %205, %208 : vector<8x8xf32>
    %210 = math.exp %209 : vector<8x8xf32>
    %cst_71 = arith.constant dense<0.000000e+00> : vector<8xf32>
    %211 = vector.multi_reduction <add>, %210, %cst_71 [1] : vector<8x8xf32> to vector<8xf32>
    %212 = vector.shape_cast %211 : vector<8xf32> to vector<8x1xf32>
    %213 = arith.truncf %210 : vector<8x8xf32> to vector<8x8xbf16>
    %cst_72 = arith.constant dense<0.000000e+00> : vector<8x8xf32>
    %214 = tpu.matmul %213, %204, %cst_72 {dimension_numbers = #tpu.dot_dimension_numbers<[1], [0], [0], [1], [0, 0, 1, 1], [], []>} : vector<8x8xbf16>, vector<8x8xbf16>, vector<8x8xf32> -> vector<8x8xf32>
    %215 = tpu.reciprocal %212 {approx = true} : vector<8x1xf32> -> vector<8x1xf32>
    %216 = vector.broadcast %215 : vector<8x1xf32> to vector<8x8xf32>
    %217 = arith.mulf %214, %216 : vector<8x8xf32>
    %218 = tpu.concatenate %169, %185, %201, %217 in 1 : vector<8x8xf32>, vector<8x8xf32>, vector<8x8xf32>, vector<8x8xf32> -> vector<8x32xf32>
    %219 = tpu.concatenate %153, %218 in 0 : vector<8x32xf32>, vector<8x32xf32> -> vector<16x32xf32>
    %220 = arith.truncf %219 : vector<16x32xf32> to vector<16x32xbf16>
    %c0_73 = arith.constant 0 : index
    %c0_74 = arith.constant 0 : index
    %221 = vector.load %arg16[%c0_73, %c0_74] : memref<32x32xbf16, #tpu.memory_space<vmem>>, vector<32x32xbf16>
    %cst_75 = arith.constant dense<0.000000e+00> : vector<16x32xf32>
    %222 = tpu.matmul %220, %221, %cst_75 {dimension_numbers = #tpu.dot_dimension_numbers<[1], [0], [0], [1], [0, 0, 1, 1], [], []>} : vector<16x32xbf16>, vector<32x32xbf16>, vector<16x32xf32> -> vector<16x32xf32>
    %c0_76 = arith.constant 0 : index
    %c0_77 = arith.constant 0 : index
    %223 = vector.load %arg17[%c0_76, %c0_77] : memref<1x32xf32, #tpu.memory_space<vmem>>, vector<1x32xf32>
    %224 = vector.broadcast %223 : vector<1x32xf32> to vector<16x32xf32>
    %225 = arith.addf %222, %224 : vector<16x32xf32>
    %226 = arith.addf %23, %225 : vector<16x32xf32>
    %c0_78 = arith.constant 0 : index
    %c0_79 = arith.constant 0 : index
    %227 = vector.load %arg6[%c0_78, %c0_79] : memref<1x32xf32, #tpu.memory_space<vmem>>, vector<1x32xf32>
    %c0_80 = arith.constant 0 : index
    %c0_81 = arith.constant 0 : index
    %228 = vector.load %arg7[%c0_80, %c0_81] : memref<1x32xf32, #tpu.memory_space<vmem>>, vector<1x32xf32>
    %cst_82 = arith.constant dense<0.000000e+00> : vector<16xf32>
    %229 = vector.multi_reduction <add>, %226, %cst_82 [1] : vector<16x32xf32> to vector<16xf32>
    %230 = vector.shape_cast %229 : vector<16xf32> to vector<16x1xf32>
    %cst_83 = arith.constant 3.200000e+01 : f32
    %231 = vector.broadcast %cst_83 : f32 to vector<16x1xf32>
    %232 = arith.divf %230, %231 : vector<16x1xf32>
    %233 = vector.broadcast %232 : vector<16x1xf32> to vector<16x32xf32>
    %234 = arith.subf %226, %233 : vector<16x32xf32>
    %235 = arith.mulf %234, %234 : vector<16x32xf32>
    %cst_84 = arith.constant dense<0.000000e+00> : vector<16xf32>
    %236 = vector.multi_reduction <add>, %235, %cst_84 [1] : vector<16x32xf32> to vector<16xf32>
    %237 = vector.shape_cast %236 : vector<16xf32> to vector<16x1xf32>
    %cst_85 = arith.constant 3.200000e+01 : f32
    %238 = vector.broadcast %cst_85 : f32 to vector<16x1xf32>
    %239 = arith.divf %237, %238 : vector<16x1xf32>
    %cst_86 = arith.constant 9.99999974E-6 : f32
    %240 = vector.broadcast %cst_86 : f32 to vector<16x1xf32>
    %241 = arith.addf %239, %240 : vector<16x1xf32>
    %242 = math.rsqrt %241 : vector<16x1xf32>
    %243 = vector.broadcast %242 : vector<16x1xf32> to vector<16x32xf32>
    %244 = arith.mulf %234, %243 : vector<16x32xf32>
    %245 = vector.broadcast %227 : vector<1x32xf32> to vector<16x32xf32>
    %246 = arith.mulf %244, %245 : vector<16x32xf32>
    %247 = vector.broadcast %228 : vector<1x32xf32> to vector<16x32xf32>
    %248 = arith.addf %246, %247 : vector<16x32xf32>
    %249 = arith.truncf %248 : vector<16x32xf32> to vector<16x32xbf16>
    %c0_87 = arith.constant 0 : index
    %c0_88 = arith.constant 0 : index
    %250 = vector.load %arg18[%c0_87, %c0_88] : memref<32x64xbf16, #tpu.memory_space<vmem>>, vector<32x64xbf16>
    %cst_89 = arith.constant dense<0.000000e+00> : vector<16x64xf32>
    %251 = tpu.matmul %249, %250, %cst_89 {dimension_numbers = #tpu.dot_dimension_numbers<[1], [0], [0], [1], [0, 0, 1, 1], [], []>} : vector<16x32xbf16>, vector<32x64xbf16>, vector<16x64xf32> -> vector<16x64xf32>
    %c0_90 = arith.constant 0 : index
    %c0_91 = arith.constant 0 : index
    %252 = vector.load %arg19[%c0_90, %c0_91] : memref<1x64xf32, #tpu.memory_space<vmem>>, vector<1x64xf32>
    %253 = vector.broadcast %252 : vector<1x64xf32> to vector<16x64xf32>
    %254 = arith.addf %251, %253 : vector<16x64xf32>
    %cst_92 = arith.constant 0.000000e+00 : f32
    %255 = vector.broadcast %cst_92 : f32 to vector<16x64xf32>
    %256 = arith.maximumf %254, %255 : vector<16x64xf32>
    %257 = arith.truncf %256 : vector<16x64xf32> to vector<16x64xbf16>
    %c0_93 = arith.constant 0 : index
    %c0_94 = arith.constant 0 : index
    %258 = vector.load %arg20[%c0_93, %c0_94] : memref<64x32xbf16, #tpu.memory_space<vmem>>, vector<64x32xbf16>
    %cst_95 = arith.constant dense<0.000000e+00> : vector<16x32xf32>
    %259 = tpu.matmul %257, %258, %cst_95 {dimension_numbers = #tpu.dot_dimension_numbers<[1], [0], [0], [1], [0, 0, 1, 1], [], []>} : vector<16x64xbf16>, vector<64x32xbf16>, vector<16x32xf32> -> vector<16x32xf32>
    %c0_96 = arith.constant 0 : index
    %c0_97 = arith.constant 0 : index
    %260 = vector.load %arg21[%c0_96, %c0_97] : memref<1x32xf32, #tpu.memory_space<vmem>>, vector<1x32xf32>
    %261 = vector.broadcast %260 : vector<1x32xf32> to vector<16x32xf32>
    %262 = arith.addf %259, %261 : vector<16x32xf32>
    %263 = arith.addf %248, %262 : vector<16x32xf32>
    %c0_98 = arith.constant 0 : index
    %c0_99 = arith.constant 0 : index
    %264 = vector.load %arg8[%c0_98, %c0_99] : memref<1x32xf32, #tpu.memory_space<vmem>>, vector<1x32xf32>
    %c0_100 = arith.constant 0 : index
    %c0_101 = arith.constant 0 : index
    %265 = vector.load %arg9[%c0_100, %c0_101] : memref<1x32xf32, #tpu.memory_space<vmem>>, vector<1x32xf32>
    %cst_102 = arith.constant dense<0.000000e+00> : vector<16xf32>
    %266 = vector.multi_reduction <add>, %263, %cst_102 [1] : vector<16x32xf32> to vector<16xf32>
    %267 = vector.shape_cast %266 : vector<16xf32> to vector<16x1xf32>
    %cst_103 = arith.constant 3.200000e+01 : f32
    %268 = vector.broadcast %cst_103 : f32 to vector<16x1xf32>
    %269 = arith.divf %267, %268 : vector<16x1xf32>
    %270 = vector.broadcast %269 : vector<16x1xf32> to vector<16x32xf32>
    %271 = arith.subf %263, %270 : vector<16x32xf32>
    %272 = arith.mulf %271, %271 : vector<16x32xf32>
    %cst_104 = arith.constant dense<0.000000e+00> : vector<16xf32>
    %273 = vector.multi_reduction <add>, %272, %cst_104 [1] : vector<16x32xf32> to vector<16xf32>
    %274 = vector.shape_cast %273 : vector<16xf32> to vector<16x1xf32>
    %cst_105 = arith.constant 3.200000e+01 : f32
    %275 = vector.broadcast %cst_105 : f32 to vector<16x1xf32>
    %276 = arith.divf %274, %275 : vector<16x1xf32>
    %cst_106 = arith.constant 9.99999974E-6 : f32
    %277 = vector.broadcast %cst_106 : f32 to vector<16x1xf32>
    %278 = arith.addf %276, %277 : vector<16x1xf32>
    %279 = math.rsqrt %278 : vector<16x1xf32>
    %280 = vector.broadcast %279 : vector<16x1xf32> to vector<16x32xf32>
    %281 = arith.mulf %271, %280 : vector<16x32xf32>
    %282 = vector.broadcast %264 : vector<1x32xf32> to vector<16x32xf32>
    %283 = arith.mulf %281, %282 : vector<16x32xf32>
    %284 = vector.broadcast %265 : vector<1x32xf32> to vector<16x32xf32>
    %285 = arith.addf %283, %284 : vector<16x32xf32>
    %286 = vector.shape_cast %285 : vector<16x32xf32> to vector<2x8x32xf32>
    %c0_107 = arith.constant 0 : index
    %c0_108 = arith.constant 0 : index
    %c0_109 = arith.constant 0 : index
    %287 = vector.load %arg22[%c0_107, %c0_108, %c0_109] : memref<2x8x32xf32, #tpu.memory_space<vmem>>, vector<2x8x32xf32>
    tpu.vector_store %arg22[%c0_107, %c0_108, %c0_109], %286 {strides = array<i32>} : memref<2x8x32xf32, #tpu.memory_space<vmem>>, vector<2x8x32xf32>,
    return
  }
  func.func @transform_0(%arg0: i32) -> (i32, i32, i32) {
    %c0_i32 = arith.constant 0 : i32
    %c0_i32_0 = arith.constant 0 : i32
    %c0_i32_1 = arith.constant 0 : i32
    return %arg0, %c0_i32, %c0_i32_0 : i32, i32, i32
  }
  func.func @transform_1(%arg0: i32) -> (i32, i32, i32) {
    %c0_i32 = arith.constant 0 : i32
    %c0_i32_0 = arith.constant 0 : i32
    %c0_i32_1 = arith.constant 0 : i32
    return %arg0, %c0_i32, %c0_i32_0 : i32, i32, i32
  }
  func.func @transform_2(%arg0: i32) -> (i32, i32, i32) {
    %c0_i32 = arith.constant 0 : i32
    %c0_i32_0 = arith.constant 0 : i32
    %c0_i32_1 = arith.constant 0 : i32
    return %arg0, %c0_i32, %c0_i32_0 : i32, i32, i32
  }
  func.func @transform_3(%arg0: i32) -> (i32, i32) {
    %c0_i32 = arith.constant 0 : i32
    %c0_i32_0 = arith.constant 0 : i32
    %c0_i32_1 = arith.constant 0 : i32
    return %c0_i32, %c0_i32_0 : i32, i32
  }
  func.func @transform_4(%arg0: i32) -> (i32, i32) {
    %c0_i32 = arith.constant 0 : i32
    %c0_i32_0 = arith.constant 0 : i32
    %c0_i32_1 = arith.constant 0 : i32
    return %c0_i32, %c0_i32_0 : i32, i32
  }
  func.func @transform_5(%arg0: i32) -> (i32, i32) {
    %c0_i32 = arith.constant 0 : i32
    %c0_i32_0 = arith.constant 0 : i32
    %c0_i32_1 = arith.constant 0 : i32
    return %c0_i32, %c0_i32_0 : i32, i32
  }
  func.func @transform_6(%arg0: i32) -> (i32, i32) {
    %c0_i32 = arith.constant 0 : i32
    %c0_i32_0 = arith.constant 0 : i32
    %c0_i32_1 = arith.constant 0 : i32
    return %c0_i32, %c0_i32_0 : i32, i32
  }
  func.func @transform_7(%arg0: i32) -> (i32, i32) {
    %c0_i32 = arith.constant 0 : i32
    %c0_i32_0 = arith.constant 0 : i32
    %c0_i32_1 = arith.constant 0 : i32
    return %c0_i32, %c0_i32_0 : i32, i32
  }
  func.func @transform_8(%arg0: i32) -> (i32, i32) {
    %c0_i32 = arith.constant 0 : i32
    %c0_i32_0 = arith.constant 0 : i32
    %c0_i32_1 = arith.constant 0 : i32
    return %c0_i32, %c0_i32_0 : i32, i32
  }
  func.func @transform_9(%arg0: i32) -> (i32, i32) {
    %c0_i32 = arith.constant 0 : i32
    %c0_i32_0 = arith.constant 0 : i32
    %c0_i32_1 = arith.constant 0 : i32
    return %c0_i32, %c0_i32_0 : i32, i32
  }
  func.func @transform_10(%arg0: i32) -> (i32, i32) {
    %c0_i32 = arith.constant 0 : i32
    %c0_i32_0 = arith.constant 0 : i32
    %c0_i32_1 = arith.constant 0 : i32
    return %c0_i32, %c0_i32_0 : i32, i32
  }
  func.func @transform_11(%arg0: i32) -> (i32, i32) {
    %c0_i32 = arith.constant 0 : i32
    %c0_i32_0 = arith.constant 0 : i32
    %c0_i32_1 = arith.constant 0 : i32
    return %c0_i32, %c0_i32_0 : i32, i32
  }
  func.func @transform_12(%arg0: i32) -> (i32, i32) {
    %c0_i32 = arith.constant 0 : i32
    %c0_i32_0 = arith.constant 0 : i32
    %c0_i32_1 = arith.constant 0 : i32
    return %c0_i32, %c0_i32_0 : i32, i32
  }
  func.func @transform_13(%arg0: i32) -> (i32, i32) {
    %c0_i32 = arith.constant 0 : i32
    %c0_i32_0 = arith.constant 0 : i32
    %c0_i32_1 = arith.constant 0 : i32
    return %c0_i32, %c0_i32_0 : i32, i32
  }
  func.func @transform_14(%arg0: i32) -> (i32, i32) {
    %c0_i32 = arith.constant 0 : i32
    %c0_i32_0 = arith.constant 0 : i32
    %c0_i32_1 = arith.constant 0 : i32
    return %c0_i32, %c0_i32_0 : i32, i32
  }
  func.func @transform_15(%arg0: i32) -> (i32, i32) {
    %c0_i32 = arith.constant 0 : i32
    %c0_i32_0 = arith.constant 0 : i32
    %c0_i32_1 = arith.constant 0 : i32
    return %c0_i32, %c0_i32_0 : i32, i32
  }
  func.func @transform_16(%arg0: i32) -> (i32, i32) {
    %c0_i32 = arith.constant 0 : i32
    %c0_i32_0 = arith.constant 0 : i32
    %c0_i32_1 = arith.constant 0 : i32
    return %c0_i32, %c0_i32_0 : i32, i32
  }
  func.func @transform_17(%arg0: i32) -> (i32, i32) {
    %c0_i32 = arith.constant 0 : i32
    %c0_i32_0 = arith.constant 0 : i32
    %c0_i32_1 = arith.constant 0 : i32
    return %c0_i32, %c0_i32_0 : i32, i32
  }
  func.func @transform_18(%arg0: i32) -> (i32, i32) {
    %c0_i32 = arith.constant 0 : i32
    %c0_i32_0 = arith.constant 0 : i32
    %c0_i32_1 = arith.constant 0 : i32
    return %c0_i32, %c0_i32_0 : i32, i32
  }
  func.func @transform_19(%arg0: i32) -> (i32, i32) {
    %c0_i32 = arith.constant 0 : i32
    %c0_i32_0 = arith.constant 0 : i32
    %c0_i32_1 = arith.constant 0 : i32
    return %c0_i32, %c0_i32_0 : i32, i32
  }
  func.func @transform_20(%arg0: i32) -> (i32, i32) {
    %c0_i32 = arith.constant 0 : i32
    %c0_i32_0 = arith.constant 0 : i32
    %c0_i32_1 = arith.constant 0 : i32
    return %c0_i32, %c0_i32_0 : i32, i32
  }
  func.func @transform_21(%arg0: i32) -> (i32, i32, i32) {
    %c0_i32 = arith.constant 0 : i32
    %c0_i32_0 = arith.constant 0 : i32
    %c0_i32_1 = arith.constant 0 : i32
    return %arg0, %c0_i32, %c0_i32_0 : i32, i32, i32
  }
}

</mosaic_0001>

<bundles_post_ra>
// kernel: run.1
= control target key start
LH: loop header
LB: loop body
LE: loop exit
PB: predicated region body
PF: predicated region fallthrough
CT: control target
= control target key end

     0   :  { %s3458_s0 = inlined_call_operand.hbm [shape: f32[2,8,32], index: 0, kind: input, shape index: {}]   ;;  %s3459_s1 = inlined_call_operand.hbm [shape: f32[2,8,32], index: 1, kind: input, shape index: {}]   ;;  %s3460_s2 = inlined_call_operand.hbm [shape: f32[2,8,32], index: 2, kind: input, shape index: {}]   ;;  %s3461_s3 = inlined_call_operand.hbm [shape: f32[1,32], index: 3, kind: input, shape index: {}]   ;;  %s3462_s4 = inlined_call_operand.hbm [shape: f32[1,32], index: 4, kind: input, shape index: {}]   ;;  %s3463_s5 = inlined_call_operand.hbm [shape: f32[1,32], index: 5, kind: input, shape index: {}]   ;;  %s3464_s6 = inlined_call_operand.hbm [shape: f32[1,32], index: 6, kind: input, shape index: {}]   ;;  %s3465_s7 = inlined_call_operand.hbm [shape: f32[1,32], index: 7, kind: input, shape index: {}]   ;;  %s3466_s8 = inlined_call_operand.hbm [shape: f32[1,32], index: 8, kind: input, shape index: {}]   ;;  %s3467_s9 = inlined_call_operand.hbm [shape: bf16[32,32], index: 9, kind: input, shape index: {}]   ;;  %s3468_s10 = inlined_call_operand.hbm [shape: f32[1,32], index: 10, kind: input, shape index: {}]   ;;  %s3469_s11 = inlined_call_operand.hbm [shape: bf16[32,32], index: 11, kind: input, shape index: {}]   ;;  %s3470_s12 = inlined_call_operand.hbm [shape: f32[1,32], index: 12, kind: input, shape index: {}]   ;;  %s3471_s13 = inlined_call_operand.hbm [shape: bf16[32,32], index: 13, kind: input, shape index: {}]   ;;  %s3472_s14 = inlined_call_operand.hbm [shape: f32[1,32], index: 14, kind: input, shape index: {}]   ;;  %s3473_s15 = inlined_call_operand.hbm [shape: bf16[32,32], index: 15, kind: input, shape index: {}]   ;;  %s3474_s16 = inlined_call_operand.hbm [shape: f32[1,32], index: 16, kind: input, shape index: {}]   ;;  %s3475_s17 = inlined_call_operand.hbm [shape: bf16[32,64], index: 17, kind: input, shape index: {}]   ;;  %s3476_s18 = inlined_call_operand.hbm [shape: f32[1,64], index: 18, kind: input, shape index: {}]   ;;  %s3477_s19 = inlined_call_operand.hbm [shape: bf16[64,32], index: 19, kind: input, shape index: {}]   ;;  %s3478_s20 = inlined_call_operand.hbm [shape: f32[1,32], index: 20, kind: input, shape index: {}]   ;;  %s3479_s21 = inlined_call_operand.hbm [shape: f32[2,8,32], index: 21, kind: output, shape index: {}]  }
   0x1   :  { %3491 = sst [smem:[#allocation48_spill]] %s3458_s0 }
   0x2   :  { %3492 = sst [smem:[#allocation49_spill]] %s3459_s1 }
   0x3   :  { %3493 = sst [smem:[#allocation50_spill]] %s3460_s2 }
   0x4   :  { %3494 = sst [smem:[#allocation51_spill]] %s3461_s3 }
   0x5   :  { %3495 = sst [smem:[#allocation52_spill]] %s3462_s4 }
   0x6   :  { %3496 = sst [smem:[#allocation53_spill]] %s3463_s5 }
   0x7   :  { %3497 = sst [smem:[#allocation54_spill]] %s3479_s21 }
   0x8   :  { %26 = vsyncpa [#allocation3], 0 }
   0x9   :  { %27 = vsyncpa [#allocation6], 0 }
   0xa   :  { %28 = vsyncpa [#allocation9], 0 }
   0xb   :  { %29 = vsyncpa [#allocation12], 0 }
   0xc   :  { %30 = vsyncpa [#allocation15], 0 }
   0xd   :  { %31 = vsyncpa [#allocation18], 0 }
   0xe   :  { %32 = vsyncpa [#allocation21], 0 }
   0xf   :  { %33 = vsyncpa [#allocation24], 0 }
  0x10   :  { %34 = vsyncpa [#allocation27], 0 }
  0x11   :  { %35 = vsyncpa [#allocation30], 0 }
  0x12   :  { %36 = vsyncpa [#allocation33], 0 }
  0x13   :  { %37 = vsyncpa [#allocation4], 0  ;;  %s2771_s2 = smov [#allocation5]   ;;  %s2772_s26 = smov [#allocation8]  }
  0x14   :  { %s55_s25 = sshll.u32 %s2771_s2, 4  ;;  %s80_s27 = sshll.u32 %s2772_s26, 4  ;;  %s56_s25 = int_to_ptr.vmem [resolvable:$true] %s55_s25  ;;  %s2914_s27 = int_to_ptr.vmem [resolvable:$true] %s80_s27 }
  0x15   :  { %s3498_s29 = sld [smem:[#allocation49_spill]] }
  0x1b   :  { %s2263_s0 = scalar_lea.hbm %s3498_s29, 256 }
  0x1c   :  { %p2264_p0 = scmp.ne.s32.totalorder %s3498_s29, %s2263_s0  ;;  %p2267_p1 = scmp.lt.u32.totalorder %s2263_s0, %s3498_s29 }
  0x1e   :  { %p2269_p2 = pnand %p2267_p1, %p2264_p0 }
  0x20   :  { %2272 = shalt.err (!%p2269_p2)
}
  0x21   :  { %s2273_s23 = scalar_lea.vmem %s56_s25, 256  ;;  %p2278_p4 = scmp.lt.s32.totalorder %s56_s25, %s56_s25 }
  0x22   :  { %p2274_p3 = scmp.ne.s32.totalorder %s56_s25, %s2273_s23  ;;  %p2279_p5 = scmp.lt.s32.totalorder %s2273_s23, %s2273_s23 }
  0x24   :  { %p2280_p6 = por %p2279_p5, %p2278_p4 }
  0x26   :  { %p2281_p7 = pnand %p2280_p6, %p2274_p3 }
  0x28   :  { %2284 = shalt.err (!%p2281_p7)
}
  0x29   :  { %s3486_s1 = smov 128   ;;  %s3488_s24 = smov 8  }
  0x2a   :  { %61 = dma.hbm_to_vmem [thread:$0]  %s3498_s29, 256, %s56_s25, [#allocation6], %s3486_s1, %s3486_s1, %s3488_s24  }
  0x2b   :  { %s3499_s0 = sld [smem:[#allocation51_spill]] }
  0x31   :  { %s2285_s4 = scalar_lea.hbm %s3499_s0, 16 }
  0x32   :  { %p2286_p8 = scmp.ne.s32.totalorder %s3499_s0, %s2285_s4  ;;  %p2289_p9 = scmp.lt.u32.totalorder %s2285_s4, %s3499_s0 }
  0x34   :  { %p2291_p10 = pnand %p2289_p9, %p2286_p8 }
  0x36   :  { %2294 = shalt.err (!%p2291_p10)
}
  0x37   :  { %s2295_s2 = scalar_lea.vmem %s2914_s27, 16  ;;  %s2299_s25 = scalar_lea.vmem %s2914_s27, 32 }
  0x38   :  { %p2296_p11 = scmp.ne.s32.totalorder %s2914_s27, %s2295_s2  ;;  %p2300_p12 = scmp.lt.s32.totalorder %s2914_s27, %s2914_s27 }
  0x39   :  { %p2301_p13 = scmp.lt.s32.totalorder %s2299_s25, %s2295_s2 }
  0x3b   :  { %p2302_p0 = por %p2301_p13, %p2300_p12 }
  0x3d   :  { %p2303_p1 = pnand %p2302_p0, %p2296_p11 }
  0x3f   :  { %2306 = shalt.err (!%p2303_p1)
}
  0x40   :  { %83 = dma.hbm_to_vmem [thread:$0]  %s3499_s0, 16, %s2914_s27, [#allocation9]  }
  0x41   :  { %s2775_s3 = smov [#allocation11]   ;;  %s2776_s4 = smov [#allocation14]  }
  0x42   :  { %s100_s28 = sshll.u32 %s2775_s3, 4  ;;  %s120_s30 = sshll.u32 %s2776_s4, 4  ;;  %s101_s28 = int_to_ptr.vmem [resolvable:$true] %s100_s28  ;;  %s121_s30 = int_to_ptr.vmem [resolvable:$true] %s120_s30 }
  0x43   :  { %s3500_s23 = sld [smem:[#allocation53_spill]] }
  0x49   :  { %s2307_s1 = scalar_lea.hbm %s3500_s23, 16 }
  0x4a   :  { %p2308_p2 = scmp.ne.s32.totalorder %s3500_s23, %s2307_s1  ;;  %p2311_p3 = scmp.lt.u32.totalorder %s2307_s1, %s3500_s23 }
  0x4c   :  { %p2313_p4 = pnand %p2311_p3, %p2308_p2 }
  0x4e   :  { %2316 = shalt.err (!%p2313_p4)
}
  0x4f   :  { %s2317_s27 = scalar_lea.vmem %s101_s28, 16  ;;  %s2321_s0 = scalar_lea.vmem %s101_s28, 32 }
  0x50   :  { %p2318_p5 = scmp.ne.s32.totalorder %s101_s28, %s2317_s27  ;;  %p2322_p6 = scmp.lt.s32.totalorder %s101_s28, %s101_s28 }
  0x51   :  { %p2323_p7 = scmp.lt.s32.totalorder %s2321_s0, %s2317_s27 }
  0x53   :  { %p2324_p8 = por %p2323_p7, %p2322_p6 }
  0x55   :  { %p2325_p9 = pnand %p2324_p8, %p2318_p5 }
  0x57   :  { %2328 = shalt.err (!%p2325_p9)
}
  0x58   :  { %103 = dma.hbm_to_vmem [thread:$0]  %s3500_s23, 16, %s101_s28, [#allocation12]  }
  0x59   :  { %s2329_s4 = scalar_lea.hbm %s3465_s7, 16 }
  0x5a   :  { %p2330_p10 = scmp.ne.s32.totalorder %s3465_s7, %s2329_s4  ;;  %p2333_p11 = scmp.lt.u32.totalorder %s2329_s4, %s3465_s7 }
  0x5c   :  { %p2335_p12 = pnand %p2333_p11, %p2330_p10 }
  0x5e   :  { %2338 = shalt.err (!%p2335_p12)
}
  0x5f   :  { %s2339_s2 = scalar_lea.vmem %s121_s30, 16  ;;  %s2343_s25 = scalar_lea.vmem %s121_s30, 32 }
  0x60   :  { %p2340_p13 = scmp.ne.s32.totalorder %s121_s30, %s2339_s2  ;;  %p2344_p0 = scmp.lt.s32.totalorder %s121_s30, %s121_s30 }
  0x61   :  { %p2345_p1 = scmp.lt.s32.totalorder %s2343_s25, %s2339_s2 }
  0x63   :  { %p2346_p2 = por %p2345_p1, %p2344_p0 }
  0x65   :  { %p2347_p3 = pnand %p2346_p2, %p2340_p13 }
  0x67   :  { %2350 = shalt.err (!%p2347_p3)
}
  0x68   :  { %123 = dma.hbm_to_vmem [thread:$0]  %s3465_s7, 16, %s121_s30, [#allocation15]  }
  0x69   :  { %s2777_s27 = smov [#allocation17]   ;;  %s2351_s24 = scalar_lea.hbm %s3467_s9, 256 }
  0x6a   :  { %s139_s0 = sshll.u32 %s2777_s27, 4  ;;  %p2352_p4 = scmp.ne.s32.totalorder %s3467_s9, %s2351_s24  ;;  %s140_s0 = int_to_ptr.vmem [resolvable:$true] %s139_s0 }
  0x6b   :  { %p2355_p5 = scmp.lt.u32.totalorder %s2351_s24, %s3467_s9 }
  0x6d   :  { %p2357_p6 = pnand %p2355_p5, %p2352_p4 }
  0x6f   :  { %2360 = shalt.err (!%p2357_p6)
}
  0x70   :  { %s2361_s5 = scalar_lea.vmem %s140_s0, 256  ;;  %p2366_p8 = scmp.lt.s32.totalorder %s140_s0, %s140_s0 }
  0x71   :  { %p2362_p7 = scmp.ne.s32.totalorder %s140_s0, %s2361_s5  ;;  %p2367_p9 = scmp.lt.s32.totalorder %s2361_s5, %s2361_s5 }
  0x73   :  { %p2368_p10 = por %p2367_p9, %p2366_p8 }
  0x75   :  { %p2369_p11 = pnand %p2368_p10, %p2362_p7 }
  0x77   :  { %2372 = shalt.err (!%p2369_p11)
}
  0x78   :  { %s2778_s7 = smov 64   ;;  %s2779_s30 = smov 4  }
  0x79   :  { %145 = dma.hbm_to_vmem [thread:$0]  %s3467_s9, 256, %s140_s0, [#allocation18], %s2778_s7, %s2778_s7, %s2779_s30  }
  0x7a   :  { %s2780_s25 = smov [#allocation20]   ;;  %s2781_s23 = smov [#allocation23]  }
  0x7b   :  { %s161_s28 = sshll.u32 %s2780_s25, 4  ;;  %s183_s27 = sshll.u32 %s2781_s23, 4  ;;  %s162_s28 = int_to_ptr.vmem [resolvable:$true] %s161_s28  ;;  %s184_s27 = int_to_ptr.vmem [resolvable:$true] %s183_s27 }
  0x7c   :  { %s2373_s24 = scalar_lea.hbm %s3469_s11, 256 }
  0x7d   :  { %p2374_p12 = scmp.ne.s32.totalorder %s3469_s11, %s2373_s24  ;;  %p2377_p13 = scmp.lt.u32.totalorder %s2373_s24, %s3469_s11 }
  0x7f   :  { %p2379_p0 = pnand %p2377_p13, %p2374_p12 }
  0x81   :  { %2382 = shalt.err (!%p2379_p0)
}
  0x82   :  { %s2383_s9 = scalar_lea.vmem %s162_s28, 256  ;;  %p2388_p2 = scmp.lt.s32.totalorder %s162_s28, %s162_s28 }
  0x83   :  { %p2384_p1 = scmp.ne.s32.totalorder %s162_s28, %s2383_s9  ;;  %p2389_p3 = scmp.lt.s32.totalorder %s2383_s9, %s2383_s9 }
  0x85   :  { %p2390_p4 = por %p2389_p3, %p2388_p2 }
  0x87   :  { %p2391_p5 = pnand %p2390_p4, %p2384_p1 }
  0x89   :  { %2394 = shalt.err (!%p2391_p5)
}
  0x8a   :  { %167 = dma.hbm_to_vmem [thread:$0]  %s3469_s11, 256, %s162_s28, [#allocation21], %s2778_s7, %s2778_s7, %s2779_s30  }
  0x8b   :  { %s2395_s25 = scalar_lea.hbm %s3471_s13, 256 }
  0x8c   :  { %p2396_p6 = scmp.ne.s32.totalorder %s3471_s13, %s2395_s25  ;;  %p2399_p7 = scmp.lt.u32.totalorder %s2395_s25, %s3471_s13 }
  0x8e   :  { %p2401_p8 = pnand %p2399_p7, %p2396_p6 }
  0x90   :  { %2404 = shalt.err (!%p2401_p8)
}
  0x91   :  { %s2405_s3 = scalar_lea.vmem %s184_s27, 256  ;;  %p2410_p10 = scmp.lt.s32.totalorder %s184_s27, %s184_s27 }
  0x92   :  { %p2406_p9 = scmp.ne.s32.totalorder %s184_s27, %s2405_s3  ;;  %p2411_p11 = scmp.lt.s32.totalorder %s2405_s3, %s2405_s3 }
  0x94   :  { %p2412_p12 = por %p2411_p11, %p2410_p10 }
  0x96   :  { %p2413_p13 = pnand %p2412_p12, %p2406_p9 }
  0x98   :  { %2416 = shalt.err (!%p2413_p13)
}
  0x99   :  { %189 = dma.hbm_to_vmem [thread:$0]  %s3471_s13, 256, %s184_s27, [#allocation24], %s2778_s7, %s2778_s7, %s2779_s30  }
  0x9a   :  { %s2782_s4 = smov [#allocation26]   ;;  %s2783_s1 = smov [#allocation29]  }
  0x9b   :  { %s205_s21 = sshll.u32 %s2782_s4, 4  ;;  %s227_s9 = sshll.u32 %s2783_s1, 4  ;;  %s206_s21 = int_to_ptr.vmem [resolvable:$true] %s205_s21  ;;  %s228_s9 = int_to_ptr.vmem [resolvable:$true] %s227_s9 }
  0x9c   :  { %s2417_s22 = scalar_lea.hbm %s3473_s15, 256 }
  0x9d   :  { %p2418_p0 = scmp.ne.s32.totalorder %s3473_s15, %s2417_s22  ;;  %p2421_p1 = scmp.lt.u32.totalorder %s2417_s22, %s3473_s15 }
  0x9f   :  { %p2423_p2 = pnand %p2421_p1, %p2418_p0 }
  0xa1   :  { %2426 = shalt.err (!%p2423_p2)
}
  0xa2   :  { %s2427_s13 = scalar_lea.vmem %s206_s21, 256  ;;  %p2432_p4 = scmp.lt.s32.totalorder %s206_s21, %s206_s21 }
  0xa3   :  { %p2428_p3 = scmp.ne.s32.totalorder %s206_s21, %s2427_s13  ;;  %p2433_p5 = scmp.lt.s32.totalorder %s2427_s13, %s2427_s13 }
  0xa5   :  { %p2434_p6 = por %p2433_p5, %p2432_p4 }
  0xa7   :  { %p2435_p7 = pnand %p2434_p6, %p2428_p3 }
  0xa9   :  { %2438 = shalt.err (!%p2435_p7)
}
  0xaa   :  { %211 = dma.hbm_to_vmem [thread:$0]  %s3473_s15, 256, %s206_s21, [#allocation27], %s2778_s7, %s2778_s7, %s2779_s30  }
  0xab   :  { %s2439_s11 = scalar_lea.hbm %s3475_s17, 256 }
  0xac   :  { %p2440_p8 = scmp.ne.s32.totalorder %s3475_s17, %s2439_s11  ;;  %p2443_p9 = scmp.lt.u32.totalorder %s2439_s11, %s3475_s17 }
  0xae   :  { %p2445_p10 = pnand %p2443_p9, %p2440_p8 }
  0xb0   :  { %2448 = shalt.err (!%p2445_p10)
}
  0xb1   :  { %s2449_s5 = scalar_lea.vmem %s228_s9, 256  ;;  %p2454_p12 = scmp.lt.s32.totalorder %s228_s9, %s228_s9 }
  0xb2   :  { %p2450_p11 = scmp.ne.s32.totalorder %s228_s9, %s2449_s5  ;;  %p2455_p13 = scmp.lt.s32.totalorder %s2449_s5, %s2449_s5 }
  0xb4   :  { %p2456_p0 = por %p2455_p13, %p2454_p12 }
  0xb6   :  { %p2457_p1 = pnand %p2456_p0, %p2450_p11 }
  0xb8   :  { %2460 = shalt.err (!%p2457_p1)
}
  0xb9   :  { %233 = dma.hbm_to_vmem [thread:$0]  %s3475_s17, 256, %s228_s9, [#allocation30], %s2778_s7, %s2778_s7, %s2779_s30  }
  0xba   :  { %s2784_s22 = smov [#allocation32]   ;;  %s2785_s25 = smov [#allocation2]  }
  0xbb   :  { %s249_s2 = sshll.u32 %s2784_s22, 4  ;;  %s43_s23 = sshll.u32 %s2785_s25, 4  ;;  %s250_s2 = int_to_ptr.vmem [resolvable:$true] %s249_s2  ;;  %s44_s23 = int_to_ptr.vmem [resolvable:$true] %s43_s23 }
  0xbc   :  { %s2461_s27 = scalar_lea.hbm %s3477_s19, 512 }
  0xbd   :  { %p2462_p2 = scmp.ne.s32.totalorder %s3477_s19, %s2461_s27  ;;  %p2465_p3 = scmp.lt.u32.totalorder %s2461_s27, %s3477_s19 }
  0xbf   :  { %p2467_p4 = pnand %p2465_p3, %p2462_p2 }
  0xc1   :  { %2470 = shalt.err (!%p2467_p4)
}
  0xc2   :  { %s2471_s17 = scalar_lea.vmem %s250_s2, 512  ;;  %p2476_p6 = scmp.lt.s32.totalorder %s250_s2, %s250_s2 }
  0xc3   :  { %p2472_p5 = scmp.ne.s32.totalorder %s250_s2, %s2471_s17  ;;  %p2477_p7 = scmp.lt.s32.totalorder %s2471_s17, %s2471_s17 }
  0xc5   :  { %p2478_p8 = por %p2477_p7, %p2476_p6 }
  0xc7   :  { %p2479_p9 = pnand %p2478_p8, %p2472_p5 }
  0xc9   :  { %2482 = shalt.err (!%p2479_p9)
}
  0xca   :  { %255 = dma.hbm_to_vmem [thread:$0]  %s3477_s19, 512, %s250_s2, [#allocation33], %s2778_s7, %s2778_s7, %s2779_s30  }
  0xcb   :  { %s3501_s0 = sld [smem:[#allocation48_spill]] }
  0xd1   :  { %s2483_s5 = scalar_lea.hbm %s3501_s0, 256 }
  0xd2   :  { %p2484_p10 = scmp.ne.s32.totalorder %s3501_s0, %s2483_s5  ;;  %p2487_p11 = scmp.lt.u32.totalorder %s2483_s5, %s3501_s0 }
  0xd4   :  { %p2489_p12 = pnand %p2487_p11, %p2484_p10 }
  0xd6   :  { %2492 = shalt.err (!%p2489_p12)
}
  0xd7   :  { %s2493_s29 = scalar_lea.vmem %s44_s23, 256  ;;  %p2498_p0 = scmp.lt.s32.totalorder %s44_s23, %s44_s23 }
  0xd8   :  { %p2494_p13 = scmp.ne.s32.totalorder %s44_s23, %s2493_s29  ;;  %p2499_p1 = scmp.lt.s32.totalorder %s2493_s29, %s2493_s29 }
  0xda   :  { %p2500_p2 = por %p2499_p1, %p2498_p0 }
  0xdc   :  { %p2501_p3 = pnand %p2500_p2, %p2494_p13 }
  0xde   :  { %2504 = shalt.err (!%p2501_p3)
}
  0xdf   :  { %s3502_s19 = smov 8   ;;  %s3503_s7 = smov 128  }
  0xe0   :  { %49 = dma.hbm_to_vmem [thread:$0]  %s3501_s0, 256, %s44_s23, [#allocation3], %s3503_s7, %s3503_s7, %s3502_s19  }
  0xe1   :  { %s2786_s13 = smov [#allocation7]   ;;  %s2787_s26 = smov [#allocation10]  }
  0xe2   :  { %s67_s27 = sshll.u32 %s2786_s13, 4  ;;  %s90_s24 = sshll.u32 %s2787_s26, 4  ;;  %s68_s27 = int_to_ptr.vmem [resolvable:$true] %s67_s27  ;;  %s91_s24 = int_to_ptr.vmem [resolvable:$true] %s90_s24 }
  0xe3   :  { %s3504_s17 = sld [smem:[#allocation50_spill]] }
  0xe9   :  { %s2505_s9 = scalar_lea.hbm %s3504_s17, 256 }
  0xea   :  { %p2506_p4 = scmp.ne.s32.totalorder %s3504_s17, %s2505_s9  ;;  %p2509_p5 = scmp.lt.u32.totalorder %s2505_s9, %s3504_s17 }
  0xec   :  { %p2511_p6 = pnand %p2509_p5, %p2506_p4 }
  0xee   :  { %2514 = shalt.err (!%p2511_p6)
}
  0xef   :  { %s2515_s23 = scalar_lea.vmem %s68_s27, 256  ;;  %p2520_p8 = scmp.lt.s32.totalorder %s68_s27, %s68_s27 }
  0xf0   :  { %p2516_p7 = scmp.ne.s32.totalorder %s68_s27, %s2515_s23  ;;  %p2521_p9 = scmp.lt.s32.totalorder %s2515_s23, %s2515_s23 }
  0xf2   :  { %p2522_p10 = por %p2521_p9, %p2520_p8 }
  0xf4   :  { %p2523_p11 = pnand %p2522_p10, %p2516_p7 }
  0xf6   :  { %2526 = shalt.err (!%p2523_p11)
}
  0xf7   :  { %73 = dma.hbm_to_vmem [thread:$0]  %s3504_s17, 256, %s68_s27, [#allocation6], %s3503_s7, %s3503_s7, %s3502_s19  }
  0xf8   :  { %s3505_s25 = sld [smem:[#allocation52_spill]] }
  0xfe   :  { %s2527_s29 = scalar_lea.hbm %s3505_s25, 16 }
  0xff   :  { %p2528_p12 = scmp.ne.s32.totalorder %s3505_s25, %s2527_s29  ;;  %p2531_p13 = scmp.lt.u32.totalorder %s2527_s29, %s3505_s25 }
 0x101   :  { %p2533_p0 = pnand %p2531_p13, %p2528_p12 }
 0x103   :  { %2536 = shalt.err (!%p2533_p0)
}
 0x104   :  { %s2537_s3 = scalar_lea.vmem %s91_s24, 16  ;;  %s2541_s11 = scalar_lea.vmem %s91_s24, 32 }
 0x105   :  { %p2538_p1 = scmp.ne.s32.totalorder %s91_s24, %s2537_s3  ;;  %p2542_p2 = scmp.lt.s32.totalorder %s91_s24, %s91_s24 }
 0x106   :  { %p2543_p3 = scmp.lt.s32.totalorder %s2541_s11, %s2537_s3 }
 0x108   :  { %p2544_p4 = por %p2543_p3, %p2542_p2 }
 0x10a   :  { %p2545_p5 = pnand %p2544_p4, %p2538_p1 }
 0x10c   :  { %2548 = shalt.err (!%p2545_p5)
}
 0x10d   :  { %93 = dma.hbm_to_vmem [thread:$0]  %s3505_s25, 16, %s91_s24, [#allocation9]  }
 0x10e   :  { %s2788_s9 = smov [#allocation13]   ;;  %s2789_s4 = smov [#allocation16]  }
 0x10f   :  { %s110_s28 = sshll.u32 %s2788_s9, 4  ;;  %s130_s1 = sshll.u32 %s2789_s4, 4  ;;  %s111_s28 = int_to_ptr.vmem [resolvable:$true] %s110_s28  ;;  %s131_s1 = int_to_ptr.vmem [resolvable:$true] %s130_s1 }
 0x110   :  { %s2549_s0 = scalar_lea.hbm %s3464_s6, 16 }
 0x111   :  { %p2550_p6 = scmp.ne.s32.totalorder %s3464_s6, %s2549_s0  ;;  %p2553_p7 = scmp.lt.u32.totalorder %s2549_s0, %s3464_s6 }
 0x113   :  { %p2555_p8 = pnand %p2553_p7, %p2550_p6 }
 0x115   :  { %2558 = shalt.err (!%p2555_p8)
}
 0x116   :  { %s2559_s24 = scalar_lea.vmem %s111_s28, 16  ;;  %s2563_s25 = scalar_lea.vmem %s111_s28, 32 }
 0x117   :  { %p2560_p9 = scmp.ne.s32.totalorder %s111_s28, %s2559_s24  ;;  %p2564_p10 = scmp.lt.s32.totalorder %s111_s28, %s111_s28 }
 0x118   :  { %p2565_p11 = scmp.lt.s32.totalorder %s2563_s25, %s2559_s24 }
 0x11a   :  { %p2566_p12 = por %p2565_p11, %p2564_p10 }
 0x11c   :  { %p2567_p13 = pnand %p2566_p12, %p2560_p9 }
 0x11e   :  { %2570 = shalt.err (!%p2567_p13)
}
 0x11f   :  { %113 = dma.hbm_to_vmem [thread:$0]  %s3464_s6, 16, %s111_s28, [#allocation12]  }
 0x120   :  { %s2571_s3 = scalar_lea.hbm %s3466_s8, 16 }
 0x121   :  { %p2572_p0 = scmp.ne.s32.totalorder %s3466_s8, %s2571_s3  ;;  %p2575_p1 = scmp.lt.u32.totalorder %s2571_s3, %s3466_s8 }
 0x123   :  { %p2577_p2 = pnand %p2575_p1, %p2572_p0 }
 0x125   :  { %2580 = shalt.err (!%p2577_p2)
}
 0x126   :  { %s2581_s4 = scalar_lea.vmem %s131_s1, 16  ;;  %s2585_s5 = scalar_lea.vmem %s131_s1, 32 }
 0x127   :  { %p2582_p3 = scmp.ne.s32.totalorder %s131_s1, %s2581_s4  ;;  %p2586_p4 = scmp.lt.s32.totalorder %s131_s1, %s131_s1 }
 0x128   :  { %p2587_p5 = scmp.lt.s32.totalorder %s2585_s5, %s2581_s4 }
 0x12a   :  { %p2588_p6 = por %p2587_p5, %p2586_p4 }
 0x12c   :  { %p2589_p7 = pnand %p2588_p6, %p2582_p3 }
 0x12e   :  { %2592 = shalt.err (!%p2589_p7)
}
 0x12f   :  { %133 = dma.hbm_to_vmem [thread:$0]  %s3466_s8, 16, %s131_s1, [#allocation15]  }
 0x130   :  { %s2790_s23 = smov [#allocation19]   ;;  %s2791_s15 = smov [#allocation22]  }
 0x131   :  { %s152_s0 = sshll.u32 %s2790_s23, 4  ;;  %s174_s21 = sshll.u32 %s2791_s15, 4  ;;  %s153_s0 = int_to_ptr.vmem [resolvable:$true] %s152_s0  ;;  %s175_s21 = int_to_ptr.vmem [resolvable:$true] %s174_s21 }
 0x132   :  { %s2593_s24 = scalar_lea.hbm %s3468_s10, 16 }
 0x133   :  { %p2594_p8 = scmp.ne.s32.totalorder %s3468_s10, %s2593_s24  ;;  %p2597_p9 = scmp.lt.u32.totalorder %s2593_s24, %s3468_s10 }
 0x135   :  { %p2599_p10 = pnand %p2597_p9, %p2594_p8 }
 0x137   :  { %2602 = shalt.err (!%p2599_p10)
}
 0x138   :  { %s2603_s8 = scalar_lea.vmem %s153_s0, 16  ;;  %s2607_s1 = scalar_lea.vmem %s153_s0, 32 }
 0x139   :  { %p2604_p11 = scmp.ne.s32.totalorder %s153_s0, %s2603_s8  ;;  %p2608_p12 = scmp.lt.s32.totalorder %s153_s0, %s153_s0 }
 0x13a   :  { %p2609_p13 = scmp.lt.s32.totalorder %s2607_s1, %s2603_s8 }
 0x13c   :  { %p2610_p0 = por %p2609_p13, %p2608_p12 }
 0x13e   :  { %p2611_p1 = pnand %p2610_p0, %p2604_p11 }
 0x140   :  { %2614 = shalt.err (!%p2611_p1)
}
 0x141   :  { %155 = dma.hbm_to_vmem [thread:$0]  %s3468_s10, 16, %s153_s0, [#allocation18]  }
 0x142   :  { %s2615_s17 = scalar_lea.hbm %s3470_s12, 16 }
 0x143   :  { %p2616_p2 = scmp.ne.s32.totalorder %s3470_s12, %s2615_s17  ;;  %p2619_p3 = scmp.lt.u32.totalorder %s2615_s17, %s3470_s12 }
 0x145   :  { %p2621_p4 = pnand %p2619_p3, %p2616_p2 }
 0x147   :  { %2624 = shalt.err (!%p2621_p4)
}
 0x148   :  { %s2625_s28 = scalar_lea.vmem %s175_s21, 16  ;;  %s2629_s23 = scalar_lea.vmem %s175_s21, 32 }
 0x149   :  { %p2626_p5 = scmp.ne.s32.totalorder %s175_s21, %s2625_s28  ;;  %p2630_p6 = scmp.lt.s32.totalorder %s175_s21, %s175_s21 }
 0x14a   :  { %p2631_p7 = scmp.lt.s32.totalorder %s2629_s23, %s2625_s28 }
 0x14c   :  { %p2632_p8 = por %p2631_p7, %p2630_p6 }
 0x14e   :  { %p2633_p9 = pnand %p2632_p8, %p2626_p5 }
 0x150   :  { %2636 = shalt.err (!%p2633_p9)
}
 0x151   :  { %177 = dma.hbm_to_vmem [thread:$0]  %s3470_s12, 16, %s175_s21, [#allocation21]  }
 0x152   :  { %s2792_s15 = smov [#allocation25]   ;;  %s2793_s29 = smov [#allocation28]  }
 0x153   :  { %s196_s22 = sshll.u32 %s2792_s15, 4  ;;  %s218_s24 = sshll.u32 %s2793_s29, 4  ;;  %s197_s22 = int_to_ptr.vmem [resolvable:$true] %s196_s22  ;;  %s219_s24 = int_to_ptr.vmem [resolvable:$true] %s218_s24 }
 0x154   :  { %s2637_s2 = scalar_lea.hbm %s3472_s14, 16 }
 0x155   :  { %p2638_p10 = scmp.ne.s32.totalorder %s3472_s14, %s2637_s2  ;;  %p2641_p11 = scmp.lt.u32.totalorder %s2637_s2, %s3472_s14 }
 0x157   :  { %p2643_p12 = pnand %p2641_p11, %p2638_p10 }
 0x159   :  { %2646 = shalt.err (!%p2643_p12)
}
 0x15a   :  { %s2647_s12 = scalar_lea.vmem %s197_s22, 16  ;;  %s2651_s21 = scalar_lea.vmem %s197_s22, 32 }
 0x15b   :  { %p2648_p13 = scmp.ne.s32.totalorder %s197_s22, %s2647_s12  ;;  %p2652_p0 = scmp.lt.s32.totalorder %s197_s22, %s197_s22 }
 0x15c   :  { %p2653_p1 = scmp.lt.s32.totalorder %s2651_s21, %s2647_s12 }
 0x15e   :  { %p2654_p2 = por %p2653_p1, %p2652_p0 }
 0x160   :  { %p2655_p3 = pnand %p2654_p2, %p2648_p13 }
 0x162   :  { %2658 = shalt.err (!%p2655_p3)
}
 0x163   :  { %199 = dma.hbm_to_vmem [thread:$0]  %s3472_s14, 16, %s197_s22, [#allocation24]  }
 0x164   :  { %s2659_s9 = scalar_lea.hbm %s3474_s16, 16 }
 0x165   :  { %p2660_p4 = scmp.ne.s32.totalorder %s3474_s16, %s2659_s9  ;;  %p2663_p5 = scmp.lt.u32.totalorder %s2659_s9, %s3474_s16 }
 0x167   :  { %p2665_p6 = pnand %p2663_p5, %p2660_p4 }
 0x169   :  { %2668 = shalt.err (!%p2665_p6)
}
 0x16a   :  { %s2669_s23 = scalar_lea.vmem %s219_s24, 16  ;;  %s2673_s10 = scalar_lea.vmem %s219_s24, 32 }
 0x16b   :  { %p2670_p7 = scmp.ne.s32.totalorder %s219_s24, %s2669_s23  ;;  %p2674_p8 = scmp.lt.s32.totalorder %s219_s24, %s219_s24 }
 0x16c   :  { %p2675_p9 = scmp.lt.s32.totalorder %s2673_s10, %s2669_s23 }
 0x16e   :  { %p2676_p10 = por %p2675_p9, %p2674_p8 }
 0x170   :  { %p2677_p11 = pnand %p2676_p10, %p2670_p7 }
 0x172   :  { %2680 = shalt.err (!%p2677_p11)
}
 0x173   :  { %221 = dma.hbm_to_vmem [thread:$0]  %s3474_s16, 16, %s219_s24, [#allocation27]  }
 0x174   :  { %s2794_s15 = smov [#allocation31]   ;;  %s2795_s29 = smov [#allocation34]  }
 0x175   :  { %s240_s22 = sshll.u32 %s2794_s15, 4  ;;  %s262_s25 = sshll.u32 %s2795_s29, 4  ;;  %s241_s22 = int_to_ptr.vmem [resolvable:$true] %s240_s22  ;;  %s263_s25 = int_to_ptr.vmem [resolvable:$true] %s262_s25 }
 0x176   :  { %s2681_s13 = scalar_lea.hbm %s3476_s18, 16 }
 0x177   :  { %p2682_p12 = scmp.ne.s32.totalorder %s3476_s18, %s2681_s13  ;;  %p2685_p13 = scmp.lt.u32.totalorder %s2681_s13, %s3476_s18 }
 0x179   :  { %p2687_p0 = pnand %p2685_p13, %p2682_p12 }
 0x17b   :  { %2690 = shalt.err (!%p2687_p0)
}
 0x17c   :  { %s2691_s16 = scalar_lea.vmem %s241_s22, 16  ;;  %s2695_s24 = scalar_lea.vmem %s241_s22, 32 }
 0x17d   :  { %p2692_p1 = scmp.ne.s32.totalorder %s241_s22, %s2691_s16  ;;  %p2696_p2 = scmp.lt.s32.totalorder %s241_s22, %s241_s22 }
 0x17e   :  { %p2697_p3 = scmp.lt.s32.totalorder %s2695_s24, %s2691_s16 }
 0x180   :  { %p2698_p4 = por %p2697_p3, %p2696_p2 }
 0x182   :  { %p2699_p5 = pnand %p2698_p4, %p2692_p1 }
 0x184   :  { %2702 = shalt.err (!%p2699_p5)
}
 0x185   :  { %243 = dma.hbm_to_vmem [thread:$0]  %s3476_s18, 16, %s241_s22, [#allocation30]  }
 0x186   :  { %s2703_s17 = scalar_lea.hbm %s3478_s20, 16 }
 0x187   :  { %p2704_p6 = scmp.ne.s32.totalorder %s3478_s20, %s2703_s17  ;;  %p2707_p7 = scmp.lt.u32.totalorder %s2703_s17, %s3478_s20 }
 0x189   :  { %p2709_p8 = pnand %p2707_p7, %p2704_p6 }
 0x18b   :  { %2712 = shalt.err (!%p2709_p8)
}
 0x18c   :  { %s2713_s28 = scalar_lea.vmem %s263_s25, 16  ;;  %s2717_s23 = scalar_lea.vmem %s263_s25, 32 }
 0x18d   :  { %p2714_p9 = scmp.ne.s32.totalorder %s263_s25, %s2713_s28  ;;  %p2718_p10 = scmp.lt.s32.totalorder %s263_s25, %s263_s25 }
 0x18e   :  { %p2719_p11 = scmp.lt.s32.totalorder %s2717_s23, %s2713_s28 }
 0x190   :  { %p2720_p12 = por %p2719_p11, %p2718_p10 }
 0x192   :  { %p2721_p13 = pnand %p2720_p12, %p2714_p9 }
 0x194   :  { %2724 = shalt.err (!%p2721_p13)
}
 0x195   :  { %265 = dma.hbm_to_vmem [thread:$0]  %s3478_s20, 16, %s263_s25, [#allocation33]  }
 0x196   :  { %2747 = dma.done.wait [#allocation3], 256  }
 0x197   :  { %2748 = vsyncadd [#allocation3], 4294967040 }
 0x198   :  { %2749 = dma.done.wait [#allocation6], 512  }
 0x199   :  { %2750 = vsyncadd [#allocation6], 4294966784 }
 0x19a   :  { %2751 = dma.done.wait [#allocation9], 32  }
 0x19b   :  { %2752 = vsyncadd [#allocation9], 4294967264 }
 0x19c   :  { %2753 = dma.done.wait [#allocation12], 32  }
 0x19d   :  { %2754 = vsyncadd [#allocation12], 4294967264 }
 0x19e   :  { %2755 = dma.done.wait [#allocation15], 32  }
 0x19f   :  { %2756 = vsyncadd [#allocation15], 4294967264 }
 0x1a0   :  { %2757 = dma.done.wait [#allocation18], 272  }
 0x1a1   :  { %2758 = vsyncadd [#allocation18], 4294967024 }
 0x1a2   :  { %2759 = dma.done.wait [#allocation21], 272  }
 0x1a3   :  { %2760 = vsyncadd [#allocation21], 4294967024 }
 0x1a4   :  { %2761 = dma.done.wait [#allocation24], 272  }
 0x1a5   :  { %2762 = vsyncadd [#allocation24], 4294967024 }
 0x1a6   :  { %2763 = dma.done.wait [#allocation27], 272  }
 0x1a7   :  { %2764 = vsyncadd [#allocation27], 4294967024 }
 0x1a8   :  { %2765 = dma.done.wait [#allocation30], 272  }
 0x1a9   :  { %2766 = vsyncadd [#allocation30], 4294967024 }
 0x1aa   :  { %2767 = dma.done.wait [#allocation33], 528  }
 0x1ab   :  { %2768 = vsyncadd [#allocation33], 4294966768  ;;  %vm334_vm0 = vcmask 261120   ;;  %v378_v0 = vld [vmem:[#allocation5] sm:$0xff]  ;;  %v379_v1 = vld [vmem:[#allocation5 + $0x8] sm:$0xff]  ;;  %v2796_v33 = vmov 0.0  }
 0x1ac   :  { %v332_v2 = vld [vmem:[#allocation2] sm:$0xff]  ;;  %v380_v3 = vsel %vm334_vm0, %v378_v0, 0.0  ;;  %v333_v5 = vld [vmem:[#allocation2 + $0x8] sm:$0xff]  ;;  %v383_v6 = vsel %vm334_vm0, %v379_v1, 0.0  ;;  %2009 = vmatprep.subr.bf16.mxu1 %v2796_v33  ;;  %2001 = vmatprep.subr.bf16.mxu0 %v2796_v33  ;;  %v2199_v35 = vld [vmem:[#allocation20 + $0x8] sm:$0xff]   ;;  %vm2797_vm1 = vmmov 0  }
 0x1ad   :  { %v335_v4 = vsel %vm334_vm0, %v332_v2, 0.0  ;;  %381 = vadd.xlane.f32.xlu0 %v380_v3  ;;  %v338_v7 = vsel %vm334_vm0, %v333_v5, 0.0  ;;  %v410_v26 = vld [vmem:[#allocation7] sm:$0xff]  ;;  %v411_v30 = vld [vmem:[#allocation7 + $0x8] sm:$0xff]  ;;  %2013 = vmatprep.mubr.msk.bf16.mxu1 %vm2797_vm1, %v2796_v33  ;;  %v1901_v60 = vld [vmem:[#allocation8] ss:$0 sm:$0xff] }
 0x1ae   :  { %336 = vadd.xlane.f32.xlu1 %v335_v4  ;;  %v412_v29 = vsel %vm334_vm0, %v410_v26, 0.0  ;;  %v415_v31 = vsel %vm334_vm0, %v411_v30, 0.0  ;;  %v2197_v32 = vld [vmem:[#allocation20] sm:$0xff]   ;;  %v2198_v34 = vld [vmem:[#allocation17] sm:$0xff]   ;;  %2005 = vmatprep.mubr.msk.bf16.mxu0 %vm2797_vm1, %v2796_v33  ;;  %v2200_v36 = vld [vmem:[#allocation17 + $0x8] sm:$0xff]   ;;  %vm649_vm2 = vcmask 64512  }
 0x1af   :  { %2010 = vmatpush3.bf16.msra.mxu1 %v2197_v32  ;;  %2002 = vmatpush3.bf16.msra.mxu0 %v2198_v34  ;;  %v1902_v3 = vld [vmem:[#allocation10] ss:$0 sm:$0xff]  ;;  %v1907_v32 = vld [vmem:[#allocation22] ss:$0 sm:$0xff]  ;;  %s2798_s20 = smov 120   ;;  %s2799_s14 = smov 104  }
 0x1b0   :  { %2011 = vmatprep.subr.bf16.mxu1 %v2796_v33  ;;  %2003 = vmatprep.subr.bf16.mxu0 %v2796_v33  ;;  %s2800_s0 = smov 112   ;;  %vm709_vm3 = vcmask 1043456   ;;  %s2801_s15 = smov 16   ;;  %vm1101_vm4 = vcmask 130048   ;;  %vm1103_vm5 = vcmask 195584   ;;  %vm1781_vm6 = vcmask 523264  }
 0x1b1   :  { %384 = vadd.xlane.f32.xlu0 %v383_v6  ;;  %s2802_s22 = smov 24   ;;  %s2803_s29 = smov [#allocation35]  }
 0x1b2   :  { %339 = vadd.xlane.f32.xlu1 %v338_v7  ;;  %s1879_s25 = sshll.u32 %s2803_s29, 4  ;;  %s1880_s25 = int_to_ptr.vmem [resolvable:$true] %s1879_s25 }
 0x1b3   :  { %2012 = vmatpush3.bf16.msra.mxu1 %v2199_v35  ;;  %2004 = vmatpush3.bf16.msra.mxu0 %v2200_v36  ;;  %s2725_s30 = scalar_lea.vmem %s1880_s25, 256  ;;  %p2730_p1 = scmp.lt.s32.totalorder %s1880_s25, %s1880_s25 }
 0x1b4   :  { %2025 = vmatprep.subr.bf16.mxu1 %v2796_v33  ;;  %2017 = vmatprep.subr.bf16.mxu0 %v2796_v33  ;;  %p2726_p0 = scmp.ne.s32.totalorder %s1880_s25, %s2725_s30  ;;  %p2731_p2 = scmp.lt.s32.totalorder %s2725_s30, %s2725_s30 }
 0x1b6   :  { %p2732_p3 = por %p2731_p2, %p2730_p1 }
 0x1b8   :  { %p2733_p4 = pnand %p2732_p3, %p2726_p0 }
 0x23a   :  { %v382_v8 = vpop.xlane.xlu0 %381 }
 0x23b   :  { %v337_v9 = vpop.xlane.xlu1 %336  ;;  %v386_v10 = vmul.f32 0.03125, %v382_v8 }
 0x23c   :  { %v342_v11 = vmul.f32 0.03125, %v337_v9 }
 0x23d   :  { %v3205_v12 = vsub.f32 %v378_v0, %v386_v10 }
 0x23e   :  { %v3207_v13 = vsub.f32 %v332_v2, %v342_v11  ;;  %v385_v14 = vpop.xlane.xlu0 %384 }
 0x23f   :  { %v340_v15 = vpop.xlane.xlu1 %339  ;;  %v387_v16 = vmul.f32 0.03125, %v385_v14  ;;  %v390_v17 = vmul.f32 %v3205_v12, %v3205_v12 }
 0x240   :  { %v343_v18 = vmul.f32 0.03125, %v340_v15  ;;  %v346_v19 = vmul.f32 %v3207_v13, %v3207_v13  ;;  %v2201_v15 = vld [vmem:[#allocation23] sm:$0xff]  }
 0x241   :  { %v3213_v20 = vsub.f32 %v379_v1, %v387_v16  ;;  %v392_v21 = vsel %vm334_vm0, %v390_v17, 0.0  ;;  %v2202_v16 = vld [vmem:[#allocation23 + $0x8] sm:$0xff]  }
 0x242   :  { %v3216_v22 = vsub.f32 %v333_v5, %v343_v18  ;;  %393 = vadd.xlane.f32.xlu0 %v392_v21  ;;  %v348_v24 = vsel %vm334_vm0, %v346_v19, 0.0 }
 0x243   :  { %v391_v23 = vmul.f32 %v3213_v20, %v3213_v20 }
 0x244   :  { %v347_v25 = vmul.f32 %v3216_v22, %v3216_v22 }
 0x245   :  { %v395_v27 = vsel %vm334_vm0, %v391_v23, 0.0 }
 0x246   :  { %396 = vadd.xlane.f32.xlu1 %v395_v27  ;;  %349 = vadd.xlane.f32.xlu0 %v348_v24  ;;  %v351_v28 = vsel %vm334_vm0, %v347_v25, 0.0 }
 0x24a   :  { %352 = vadd.xlane.f32.xlu1 %v351_v28  ;;  %413 = vadd.xlane.f32.xlu0 %v412_v29 }
 0x24e   :  { %416 = vadd.xlane.f32.xlu1 %v415_v31 }
 0x2cf   :  { %v394_v37 = vpop.xlane.xlu0 %393 }
 0x2d0   :  { %v398_v38 = vmul.f32 0.03125, %v394_v37 }
 0x2d2   :  { %v400_v39 = vadd.f32 1e-05, %v398_v38 }
 0x2d3   :  { %v350_v40 = vpop.xlane.xlu0 %349  ;;  %v397_v41 = vpop.xlane.xlu1 %396 }
 0x2d4   :  { %2211 = vrsqrt.f32 %v400_v39  ;;  %v354_v42 = vmul.f32 0.03125, %v350_v40  ;;  %v399_v43 = vmul.f32 0.03125, %v397_v41  ;;  %v1903_v40 = vld [vmem:[#allocation19] ss:$0 sm:$0xff] }
 0x2d6   :  { %v356_v44 = vadd.f32 1e-05, %v354_v42  ;;  %v401_v45 = vadd.f32 1e-05, %v399_v43 }
 0x2d7   :  { %v353_v46 = vpop.xlane.xlu1 %352  ;;  %v414_v47 = vpop.xlane.xlu0 %413 }
 0x2d8   :  { %2213 = vrsqrt.f32 %v356_v44  ;;  %v355_v48 = vmul.f32 0.03125, %v353_v46  ;;  %v418_v49 = vmul.f32 0.03125, %v414_v47 }
 0x2d9   :  { %2215 = vrsqrt.f32 %v401_v45 }
 0x2da   :  { %v357_v50 = vadd.f32 1e-05, %v355_v48  ;;  %v420_v51 = vsub.f32 %v410_v26, %v418_v49 }
 0x2db   :  { %v417_v52 = vpop.xlane.xlu1 %416 }
 0x2dc   :  { %2217 = vrsqrt.f32 %v357_v50  ;;  %v419_v53 = vmul.f32 0.03125, %v417_v52  ;;  %v422_v54 = vmul.f32 %v420_v51, %v420_v51 }
 0x2de   :  { %v2212_v55 = vpop.eup %2211  ;;  %v421_v56 = vsub.f32 %v411_v30, %v419_v53  ;;  %v424_v57 = vsel %vm334_vm0, %v422_v54, 0.0 }
 0x2df   :  { %425 = vadd.xlane.f32.xlu0 %v424_v57  ;;  %v404_v58 = vmul.f32 %v2212_v55, %v3205_v12 }
 0x2e0   :  { %v423_v59 = vmul.f32 %v421_v56, %v421_v56 }
 0x2e1   :  { %v406_v2 = vmul.f32 %v1901_v60, %v404_v58 }
 0x2e2   :  { %v2214_v61 = vpop.eup %2213  ;;  %v427_v62 = vsel %vm334_vm0, %v423_v59, 0.0 }
 0x2e3   :  { %v2216_v63 = vpop.eup %2215  ;;  %v360_v0 = vmul.f32 %v2214_v61, %v3207_v13  ;;  %428 = vadd.xlane.f32.xlu1 %v427_v62  ;;  %v408_v8 = vadd.f32 %v1902_v3, %v406_v2 }
 0x2e4   :  { %v405_v1 = vmul.f32 %v2216_v63, %v3213_v20 }
 0x2e5   :  { %v368_v7 = vmul.f32 %v1901_v60, %v360_v0  ;;  %v1911_v0 = vld [vmem:[#allocation25] ss:$0 sm:$0xff] }
 0x2e6   :  { %v2218_v4 = vpop.eup %2217  ;;  %v407_v5 = vmul.f32 %v1901_v60, %v405_v1 }
 0x2e7   :  { %v361_v6 = vmul.f32 %v2218_v4, %v3216_v22  ;;  %v3243_v12 = vadd.f32 %v1902_v3, %v368_v7 }
 0x2e8   :  { %v409_v9 = vadd.f32 %v1902_v3, %v407_v5 }
 0x2e9   :  { %v369_v10 = vmul.f32 %v1901_v60, %v361_v6 }
 0x2ea   :  { %v511_v11 = vpack.c.bf16 %v409_v9, %v408_v8 }
 0x2eb   :  { %v3245_v14 = vadd.f32 %v1902_v3, %v369_v10 }
 0x2ec   :  { %2014 = vmatmul.mubr.msk.bf16.vlgmr.msra.gmra.mrb[0].mxu1 %vm334_vm0, %v511_v11 }
 0x2ed   :  { %v442_v13 = vpack.c.bf16 %v3245_v14, %v3243_v12  ;;  %2027 = vmatprep.mubr.msk.bf16.mxu1 %vm2797_vm1, %v2796_v33 }
 0x2ef   :  { %2006 = vmatmul.mubr.msk.bf16.vlgmr.msra.gmra.mrb[0].mxu0 %vm334_vm0, %v442_v13 }
 0x2f0   :  { %2021 = vmatprep.mubr.msk.bf16.mxu0 %vm2797_vm1, %v2796_v33  ;;  %2018 = vmatpush3.bf16.msra.mxu0 %v2201_v15 }
 0x2f1   :  { %2019 = vmatprep.subr.bf16.mxu0 %v2796_v33 }
 0x2f4   :  { %2020 = vmatpush3.bf16.msra.mxu0 %v2202_v16 }
 0x2f5   :  { %2031 = vmatprep.subr.bf16.mxu0 %v2796_v33 }
 0x36c   :  { %v426_v17 = vpop.xlane.xlu0 %425 }
 0x36d   :  { %v430_v18 = vmul.f32 0.03125, %v426_v17 }
 0x36f   :  { %v432_v19 = vadd.f32 1e-05, %v430_v18 }
 0x370   :  { %v429_v20 = vpop.xlane.xlu1 %428 }
 0x371   :  { %2219 = vrsqrt.f32 %v432_v19  ;;  %v431_v21 = vmul.f32 0.03125, %v429_v20 }
 0x373   :  { %v433_v22 = vadd.f32 1e-05, %v431_v21 }
 0x375   :  { %2221 = vrsqrt.f32 %v433_v22 }
 0x37b   :  { %v2220_v23 = vpop.eup %2219 }
 0x37c   :  { %v436_v24 = vmul.f32 %v2220_v23, %v420_v51 }
 0x37e   :  { %v438_v25 = vmul.f32 %v1901_v60, %v436_v24 }
 0x37f   :  { %v2222_v26 = vpop.eup %2221 }
 0x380   :  { %v437_v27 = vmul.f32 %v2222_v26, %v421_v56  ;;  %v440_v29 = vadd.f32 %v1902_v3, %v438_v25 }
 0x382   :  { %v439_v28 = vmul.f32 %v1901_v60, %v437_v27 }
 0x384   :  { %v441_v30 = vadd.f32 %v1902_v3, %v439_v28 }
 0x386   :  { %v580_v31 = vpack.c.bf16 %v441_v30, %v440_v29 }
 0x388   :  { %2022 = vmatmul.mubr.msk.bf16.vlgmr.msra.gmra.mrb[4].mxu0 %vm334_vm0, %v580_v31 }
 0x389   :  { %2033 = vmatprep.mubr.msk.bf16.mxu0 %vm2797_vm1, %v2796_v33 }
 0x3bf   :  { %v572_v34 = vpop.f32.mrb[0].mxu1 }
 0x3c0   :  { %v2015_v35 = vpop.f32.mrb[1].mxu1  ;;  %v573_v37 = vadd.f32 %v1907_v32, %v572_v34 }
 0x3c1   :  { %v575_v36 = vpop.f32.mrb[2].mxu1 }
 0x3c2   :  { %v576_v38 = vadd.f32 %v1907_v32, %v575_v36  ;;  %v2016_v39 = vpop.f32.mrb[3].mxu1  ;;  %v503_v41 = vpop.f32.mrb[0].mxu0 }
 0x3c3   :  { %v2007_v42 = vpop.f32.mrb[1].mxu0  ;;  %v504_v45 = vadd.f32 %v1903_v40, %v503_v41 }
 0x3c4   :  { %v579_v43 = vpack.c.bf16 %v576_v38, %v573_v37  ;;  %v506_v44 = vpop.f32.mrb[2].mxu0 }
 0x3c5   :  { %v507_v46 = vadd.f32 %v1903_v40, %v506_v44  ;;  %v2008_v47 = vpop.f32.mrb[3].mxu0 }
 0x3c6   :  { %759 = vrot.lane.b32.xlu0 %v579_v43, %s2798_s20  ;;  %v654_v48 = vsel %vm649_vm2, %v579_v43, 0  ;;  %v1106_v50 = vrot.slane %v579_v43, 4 }
 0x3c7   :  { %v510_v49 = vpack.c.bf16 %v507_v46, %v504_v45  ;;  %2026 = vmatpush3.bf16.xpose.msra.mxu1 %v654_v48 }
 0x3c8   :  { %2037 = vmatprep.subr.bf16.mxu1 %v2796_v33  ;;  %v1111_v61 = vsel %vm649_vm2, %v1106_v50, 0 }
 0x3c9   :  { %756 = vrot.lane.b32.xlu1 %v510_v49, %s2798_s20  ;;  %v1105_v51 = vrot.slane %v510_v49, 4 }
 0x3ca   :  { %980 = vrot.lane.b32.xlu0 %v579_v43, %s2799_s14 }
 0x3cd   :  { %870 = vrot.lane.b32.xlu1 %v579_v43, %s2800_s0 }
 0x3ce   :  { %1214 = vrot.lane.b32.xlu0 %v1106_v50, %s2798_s20  ;;  %2028 = vmatmul.mubr.msk.bf16.vlgmr.msra.gmra.mrb[4].mxu1 %vm649_vm2, %v510_v49 }
 0x3cf   :  { %2039 = vmatprep.mubr.msk.bf16.mxu1 %vm2797_vm1, %v2796_v33 }
 0x3d1   :  { %868 = vrot.lane.b32.xlu1 %v510_v49, %s2800_s0 }
 0x3d2   :  { %1324 = vrot.lane.b32.xlu0 %v1106_v50, %s2800_s0 }
 0x3d5   :  { %978 = vrot.lane.b32.xlu1 %v510_v49, %s2799_s14 }
 0x3d6   :  { %1434 = vrot.lane.b32.xlu0 %v1106_v50, %s2799_s14 }
 0x3d9   :  { %1212 = vrot.lane.b32.xlu1 %v1105_v51, %s2798_s20 }
 0x3dd   :  { %1322 = vrot.lane.b32.xlu1 %v1105_v51, %s2800_s0 }
 0x3e1   :  { %1432 = vrot.lane.b32.xlu1 %v1105_v51, %s2799_s14 }
 0x438   :  { %v760_v52 = vpop.permute.xlu0 %759 }
 0x439   :  { %v765_v53 = vsel %vm649_vm2, %v760_v52, 0 }
 0x43a   :  { %2038 = vmatpush3.bf16.xpose.msra.mxu1 %v765_v53 }
 0x43b   :  { %v757_v54 = vpop.permute.xlu1 %756  ;;  %2049 = vmatprep.subr.bf16.mxu1 %v2796_v33 }
 0x43c   :  { %v981_v57 = vpop.permute.xlu0 %980 }
 0x43d   :  { %v986_v59 = vsel %vm649_vm2, %v981_v57, 0 }
 0x43f   :  { %v871_v55 = vpop.permute.xlu1 %870 }
 0x440   :  { %v876_v56 = vsel %vm649_vm2, %v871_v55, 0  ;;  %v1215_v62 = vpop.permute.xlu0 %1214 }
 0x441   :  { %2040 = vmatmul.mubr.msk.bf16.vlgmr.msra.gmra.mrb[8].mxu1 %vm649_vm2, %v757_v54  ;;  %v1220_v63 = vsel %vm649_vm2, %v1215_v62, 0 }
 0x442   :  { %2050 = vmatpush3.bf16.xpose.msra.mxu1 %v876_v56  ;;  %2051 = vmatprep.mubr.msk.bf16.mxu1 %vm2797_vm1, %v2796_v33 }
 0x443   :  { %2061 = vmatprep.subr.bf16.mxu1 %v2796_v33  ;;  %v869_v58 = vpop.permute.xlu1 %868 }
 0x444   :  { %v1325_v4 = vpop.permute.xlu0 %1324 }
 0x445   :  { %v1330_v10 = vsel %vm649_vm2, %v1325_v4, 0 }
 0x447   :  { %v979_v60 = vpop.permute.xlu1 %978 }
 0x448   :  { %v1435_v13 = vpop.permute.xlu0 %1434 }
 0x449   :  { %2052 = vmatmul.mubr.msk.bf16.vlgmr.msra.gmra.mrb[12].mxu1 %vm649_vm2, %v869_v58  ;;  %v1440_v16 = vsel %vm649_vm2, %v1435_v13, 0 }
 0x44a   :  { %2062 = vmatpush3.bf16.xpose.msra.mxu1 %v986_v59  ;;  %2063 = vmatprep.mubr.msk.bf16.mxu1 %vm2797_vm1, %v2796_v33 }
 0x44b   :  { %2073 = vmatprep.subr.bf16.mxu1 %v2796_v33  ;;  %v1213_v8 = vpop.permute.xlu1 %1212 }
 0x44f   :  { %v1323_v15 = vpop.permute.xlu1 %1322 }
 0x451   :  { %2064 = vmatmul.mubr.msk.bf16.vlgmr.msra.gmra.mrb[16].mxu1 %vm649_vm2, %v979_v60 }
 0x452   :  { %2074 = vmatpush3.bf16.xpose.msra.mxu1 %v1111_v61  ;;  %2075 = vmatprep.mubr.msk.bf16.mxu1 %vm2797_vm1, %v2796_v33 }
 0x453   :  { %2085 = vmatprep.subr.bf16.mxu1 %v2796_v33  ;;  %v1433_v17 = vpop.permute.xlu1 %1432 }
 0x459   :  { %2076 = vmatmul.mubr.msk.bf16.vlgmr.msra.gmra.mrb[20].mxu1 %vm649_vm2, %v1105_v51 }
 0x45a   :  { %2086 = vmatpush3.bf16.xpose.msra.mxu1 %v1220_v63  ;;  %2087 = vmatprep.mubr.msk.bf16.mxu1 %vm2797_vm1, %v2796_v33 }
 0x45b   :  { %v641_v1 = vpop.f32.mrb[4].mxu0  ;;  %2097 = vmatprep.subr.bf16.mxu1 %v2796_v33 }
 0x45c   :  { %v2023_v2 = vpop.f32.mrb[5].mxu0  ;;  %v642_v5 = vadd.f32 %v1911_v0, %v641_v1 }
 0x45d   :  { %v644_v3 = vpop.f32.mrb[6].mxu0 }
 0x45e   :  { %v645_v6 = vadd.f32 %v1911_v0, %v644_v3  ;;  %v2024_v7 = vpop.f32.mrb[7].mxu0 }
 0x460   :  { %v3299_v9 = vpack.c.bf16 %v645_v6, %v642_v5 }
 0x461   :  { %2088 = vmatmul.mubr.msk.bf16.vlgmr.msra.gmra.mrb[24].mxu1 %vm649_vm2, %v1213_v8 }
 0x462   :  { %2098 = vmatpush3.bf16.xpose.msra.mxu1 %v1330_v10  ;;  %928 = vrot.lane.b32.xlu0 %v3299_v9, %s2800_s0  ;;  %v711_v11 = vsel %vm709_vm3, %v3299_v9, 0  ;;  %v3329_v37 = vrot.slane %v3299_v9, 4 }
 0x463   :  { %818 = vrot.lane.b32.xlu1 %v3299_v9, %s2798_s20  ;;  %2032 = vmatpush3.bf16.msra.mxu0 %v711_v11 }
 0x464   :  { %2099 = vmatprep.mubr.msk.bf16.mxu1 %vm2797_vm1, %v2796_v33  ;;  %2109 = vmatprep.subr.bf16.mxu1 %v2796_v33 }
 0x465   :  { %2043 = vmatprep.subr.bf16.mxu0 %v2796_v33 }
 0x469   :  { %2100 = vmatmul.mubr.msk.bf16.vlgmr.msra.gmra.mrb[28].mxu1 %vm649_vm2, %v1323_v15 }
 0x46a   :  { %2110 = vmatpush3.bf16.xpose.msra.mxu1 %v1440_v16  ;;  %2111 = vmatprep.mubr.msk.bf16.mxu1 %vm2797_vm1, %v2796_v33 }
 0x46b   :  { %2121 = vmatprep.subr.bf16.mxu1 %v2796_v33 }
 0x471   :  { %2112 = vmatmul.mubr.msk.bf16.vlgmr.msra.gmra.mrb[32].mxu1 %vm649_vm2, %v1433_v17 }
 0x472   :  { %2125 = vmatprep.mubr.msk.bf16.mxu1 %vm2797_vm1, %v2796_v33 }
 0x4a1   :  { %v690_v18 = vpop.f32.mrb[4].mxu1 }
 0x4a2   :  { %v2029_v19 = vpop.f32.mrb[5].mxu1  ;;  %v696_v20 = vsel %vm649_vm2, %v690_v18, -inf }
 0x4a3   :  { %v693_v21 = vpop.f32.mrb[6].mxu1  ;;  %697 = vmax.xlane.f32.xlu0 %v696_v20 }
 0x4a4   :  { %v2030_v22 = vpop.f32.mrb[7].mxu1 }
 0x4d4   :  { %v929_v40 = vpop.permute.xlu0 %928 }
 0x4d5   :  { %v819_v57 = vpop.permute.xlu1 %818  ;;  %v934_v17 = vsel %vm709_vm3, %v929_v40, 0 }
 0x4d6   :  { %v824_v60 = vsel %vm709_vm3, %v819_v57, 0 }
 0x514   :  { %v801_v23 = vpop.f32.mrb[8].mxu1 }
 0x515   :  { %v2041_v24 = vpop.f32.mrb[9].mxu1  ;;  %v807_v25 = vsel %vm649_vm2, %v801_v23, -inf }
 0x516   :  { %v804_v26 = vpop.f32.mrb[10].mxu1  ;;  %808 = vmax.xlane.f32.xlu1 %v807_v25 }
 0x517   :  { %v2042_v27 = vpop.f32.mrb[11].mxu1 }
 0x51c   :  { %v912_v28 = vpop.f32.mrb[12].mxu1 }
 0x51d   :  { %v2053_v29 = vpop.f32.mrb[13].mxu1  ;;  %v918_v30 = vsel %vm649_vm2, %v912_v28, -inf }
 0x51e   :  { %v915_v31 = vpop.f32.mrb[14].mxu1  ;;  %919 = vmax.xlane.f32.xlu0 %v918_v30  ;;  %v1168_v29 = vsel %vm709_vm3, %v3329_v37, 0 }
 0x51f   :  { %v2054_v32 = vpop.f32.mrb[15].mxu1 }
 0x524   :  { %v3324_v34 = vpop.f32.mrb[16].mxu1 }
 0x525   :  { %v2065_v35 = vpop.f32.mrb[17].mxu1  ;;  %v1028_v36 = vsel %vm649_vm2, %v3324_v34, -inf }
 0x526   :  { %v1025_v38 = vpop.f32.mrb[18].mxu1  ;;  %1029 = vmax.xlane.f32.xlu0 %v1028_v36 }
 0x527   :  { %v2066_v39 = vpop.f32.mrb[19].mxu1  ;;  %1272 = vrot.lane.b32.xlu1 %v3329_v37, %s2798_s20 }
 0x52c   :  { %v3333_v41 = vpop.f32.mrb[20].mxu1 }
 0x52d   :  { %v2077_v42 = vpop.f32.mrb[21].mxu1  ;;  %v1153_v43 = vsel %vm649_vm2, %v3333_v41, -inf }
 0x52e   :  { %v1150_v44 = vpop.f32.mrb[22].mxu1  ;;  %1154 = vmax.xlane.f32.xlu0 %v1153_v43 }
 0x52f   :  { %v2078_v45 = vpop.f32.mrb[23].mxu1 }
 0x530   :  { %v698_v46 = vpop.xlane.xlu0 %697 }
 0x531   :  { %v699_v47 = vsub.f32 %v690_v18, %v698_v46 }
 0x533   :  { %v700_v48 = vmul.f32 1.442695, %v699_v47 }
 0x534   :  { %v3337_v49 = vpop.f32.mrb[24].mxu1 }
 0x535   :  { %2223 = vpow2.f32 %v700_v48  ;;  %v2089_v50 = vpop.f32.mrb[25].mxu1  ;;  %v1262_v2 = vsel %vm649_vm2, %v3337_v49, -inf }
 0x536   :  { %v1259_v51 = vpop.f32.mrb[26].mxu1 }
 0x537   :  { %v2090_v52 = vpop.f32.mrb[27].mxu1 }
 0x53c   :  { %v3339_v53 = vpop.f32.mrb[28].mxu1 }
 0x53d   :  { %v2101_v54 = vpop.f32.mrb[29].mxu1  ;;  %v1372_v1 = vsel %vm649_vm2, %v3339_v53, -inf }
 0x53e   :  { %v1369_v55 = vpop.f32.mrb[30].mxu1 }
 0x53f   :  { %v3341_v56 = vpop.eup %2223  ;;  %v2102_v58 = vpop.f32.mrb[31].mxu1 }
 0x540   :  { %v705_v59 = vpack.c.bf16 %v3341_v56, %v3341_v56  ;;  %v702_v55 = vsel %vm649_vm2, %v3341_v56, 0.0 }
 0x542   :  { %2034 = vmatmul.mubr.msk.bf16.vlgmr.msra.gmra.mrb[8].mxu0 %vm649_vm2, %v705_v59 }
 0x543   :  { %2044 = vmatpush3.bf16.msra.mxu0 %v824_v60  ;;  %2045 = vmatprep.mubr.msk.bf16.mxu0 %vm2797_vm1, %v2796_v33 }
 0x544   :  { %v3349_v61 = vpop.f32.mrb[32].mxu1  ;;  %1038 = vrot.lane.b32.xlu0 %v3299_v9, %s2799_s14  ;;  %2055 = vmatprep.subr.bf16.mxu0 %v2796_v33 }
 0x545   :  { %v2113_v62 = vpop.f32.mrb[33].mxu1  ;;  %v1482_v3 = vsel %vm649_vm2, %v3349_v61, -inf }
 0x546   :  { %v1479_v63 = vpop.f32.mrb[34].mxu1 }
 0x547   :  { %v2114_v0 = vpop.f32.mrb[35].mxu1 }
 0x54b   :  { %1373 = vmax.xlane.f32.xlu1 %v1372_v1 }
 0x55c   :  { %1492 = vrot.lane.b32.xlu1 %v3329_v37, %s2799_s14 }
 0x563   :  { %1263 = vmax.xlane.f32.xlu0 %v1262_v2 }
 0x567   :  { %1483 = vmax.xlane.f32.xlu0 %v1482_v3 }
 0x57d   :  { %1382 = vrot.lane.b32.xlu0 %v3329_v37, %s2800_s0 }
 0x5a3   :  { %v809_v4 = vpop.xlane.xlu1 %808 }
 0x5a4   :  { %v810_v5 = vsub.f32 %v801_v23, %v809_v4 }
 0x5a6   :  { %v811_v6 = vmul.f32 1.442695, %v810_v5 }
 0x5a7   :  { %v1273_v31 = vpop.permute.xlu1 %1272 }
 0x5a8   :  { %2225 = vpow2.f32 %v811_v6 }
 0x5ab   :  { %v920_v7 = vpop.xlane.xlu0 %919 }
 0x5ac   :  { %v921_v8 = vsub.f32 %v912_v28, %v920_v7 }
 0x5ae   :  { %v922_v9 = vmul.f32 1.442695, %v921_v8 }
 0x5b0   :  { %2227 = vpow2.f32 %v922_v9 }
 0x5b2   :  { %v2226_v10 = vpop.eup %2225 }
 0x5b3   :  { %v1030_v11 = vpop.xlane.xlu0 %1029  ;;  %v813_v13 = vsel %vm649_vm2, %v2226_v10, 0.0  ;;  %v816_v15 = vpack.c.bf16 %v2226_v10, %v2226_v10 }
 0x5b4   :  { %v1031_v16 = vsub.f32 %v3324_v34, %v1030_v11  ;;  %814 = vadd.xlane.f32.xlu1 %v813_v13  ;;  %v1278_v34 = vsel %vm709_vm3, %v1273_v31, 0 }
 0x5b5   :  { %2046 = vmatmul.mubr.msk.bf16.vlgmr.msra.gmra.mrb[12].mxu0 %vm649_vm2, %v816_v15 }
 0x5b6   :  { %v1032_v18 = vmul.f32 1.442695, %v1031_v16  ;;  %2056 = vmatpush3.bf16.msra.mxu0 %v934_v17  ;;  %2057 = vmatprep.mubr.msk.bf16.mxu0 %vm2797_vm1, %v2796_v33 }
 0x5b7   :  { %2067 = vmatprep.subr.bf16.mxu0 %v2796_v33 }
 0x5b8   :  { %2229 = vpow2.f32 %v1032_v18 }
 0x5ba   :  { %v2228_v19 = vpop.eup %2227 }
 0x5bb   :  { %v1155_v20 = vpop.xlane.xlu0 %1154  ;;  %v924_v21 = vsel %vm649_vm2, %v2228_v19, 0.0  ;;  %v927_v22 = vpack.c.bf16 %v2228_v19, %v2228_v19 }
 0x5bc   :  { %v1156_v23 = vsub.f32 %v3333_v41, %v1155_v20  ;;  %925 = vadd.xlane.f32.xlu1 %v924_v21 }
 0x5bd   :  { %2058 = vmatmul.mubr.msk.bf16.vlgmr.msra.gmra.mrb[16].mxu0 %vm649_vm2, %v927_v22 }
 0x5be   :  { %v1157_v24 = vmul.f32 1.442695, %v1156_v23  ;;  %2069 = vmatprep.mubr.msk.bf16.mxu0 %vm2797_vm1, %v2796_v33 }
 0x5bf   :  { %v1039_v25 = vpop.permute.xlu0 %1038 }
 0x5c0   :  { %2231 = vpow2.f32 %v1157_v24  ;;  %v1044_v26 = vsel %vm709_vm3, %v1039_v25, 0 }
 0x5c1   :  { %2068 = vmatpush3.bf16.msra.mxu0 %v1044_v26 }
 0x5c2   :  { %v2230_v27 = vpop.eup %2229  ;;  %2079 = vmatprep.subr.bf16.mxu0 %v2796_v33 }
 0x5c3   :  { %v1037_v28 = vpack.c.bf16 %v2230_v27, %v2230_v27 }
 0x5c5   :  { %2070 = vmatmul.mubr.msk.bf16.vlgmr.msra.gmra.mrb[20].mxu0 %vm649_vm2, %v1037_v28 }
 0x5c6   :  { %2080 = vmatpush3.bf16.msra.mxu0 %v1168_v29  ;;  %2081 = vmatprep.mubr.msk.bf16.mxu0 %vm2797_vm1, %v2796_v33 }
 0x5c7   :  { %2091 = vmatprep.subr.bf16.mxu0 %v2796_v33 }
 0x5ca   :  { %v2232_v30 = vpop.eup %2231 }
 0x5cb   :  { %v1162_v32 = vpack.c.bf16 %v2232_v30, %v2232_v30  ;;  %v1159_v57 = vsel %vm649_vm2, %v2232_v30, 0.0  ;;  %v2203_v30 = vld [vmem:[#allocation26] sm:$0xff]  }
 0x5cc   :  { %2122 = vmatpush3.bf16.msra.mxu1 %v2203_v30 }
 0x5cd   :  { %2082 = vmatmul.mubr.msk.bf16.vlgmr.msra.gmra.mrb[24].mxu0 %vm649_vm2, %v1162_v32  ;;  %2123 = vmatprep.subr.bf16.mxu1 %v2796_v33 }
 0x5ce   :  { %2092 = vmatpush3.bf16.msra.mxu0 %v1278_v34  ;;  %2093 = vmatprep.mubr.msk.bf16.mxu0 %vm2797_vm1, %v2796_v33 }
 0x5cf   :  { %2103 = vmatprep.subr.bf16.mxu0 %v2796_v33 }
 0x5d8   :  { %v1374_v35 = vpop.xlane.xlu1 %1373 }
 0x5d9   :  { %v1375_v36 = vsub.f32 %v3339_v53, %v1374_v35 }
 0x5db   :  { %v1376_v37 = vmul.f32 1.442695, %v1375_v36 }
 0x5dc   :  { %v1493_v54 = vpop.permute.xlu1 %1492 }
 0x5dd   :  { %2233 = vpow2.f32 %v1376_v37  ;;  %v1498_v59 = vsel %vm709_vm3, %v1493_v54, 0 }
 0x5e7   :  { %v2234_v38 = vpop.eup %2233 }
 0x5e8   :  { %v1378_v39 = vsel %vm649_vm2, %v2234_v38, 0.0  ;;  %v1381_v58 = vpack.c.bf16 %v2234_v38, %v2234_v38 }
 0x5e9   :  { %1379 = vadd.xlane.f32.xlu1 %v1378_v39 }
 0x5f0   :  { %v1264_v40 = vpop.xlane.xlu0 %1263 }
 0x5f1   :  { %v1265_v41 = vsub.f32 %v3337_v49, %v1264_v40  ;;  %v1034_v49 = vsel %vm649_vm2, %v2230_v27, 0.0 }
 0x5f3   :  { %v1266_v42 = vmul.f32 1.442695, %v1265_v41  ;;  %v2204_v41 = vld [vmem:[#allocation26 + $0x8] sm:$0xff]  }
 0x5f4   :  { %v1484_v43 = vpop.xlane.xlu0 %1483  ;;  %2124 = vmatpush3.bf16.msra.mxu1 %v2204_v41 }
 0x5f5   :  { %2235 = vpow2.f32 %v1266_v42  ;;  %v1485_v44 = vsub.f32 %v3349_v61, %v1484_v43  ;;  %2137 = vmatprep.subr.bf16.mxu1 %v2796_v33 }
 0x5f7   :  { %v1486_v45 = vmul.f32 1.442695, %v1485_v44 }
 0x5f8   :  { %v1383_v47 = vpop.permute.xlu0 %1382 }
 0x5f9   :  { %2237 = vpow2.f32 %v1486_v45  ;;  %v1388_v51 = vsel %vm709_vm3, %v1383_v47, 0 }
 0x5ff   :  { %v2236_v46 = vpop.eup %2235 }
 0x600   :  { %v1268_v48 = vsel %vm649_vm2, %v2236_v46, 0.0  ;;  %v1271_v50 = vpack.c.bf16 %v2236_v46, %v2236_v46 }
 0x601   :  { %1269 = vadd.xlane.f32.xlu0 %v1268_v48 }
 0x602   :  { %2094 = vmatmul.mubr.msk.bf16.vlgmr.msra.gmra.mrb[28].mxu0 %vm649_vm2, %v1271_v50 }
 0x603   :  { %v2238_v52 = vpop.eup %2237  ;;  %2104 = vmatpush3.bf16.msra.mxu0 %v1388_v51  ;;  %2105 = vmatprep.mubr.msk.bf16.mxu0 %vm2797_vm1, %v2796_v33 }
 0x604   :  { %v1488_v53 = vsel %vm649_vm2, %v2238_v52, 0.0  ;;  %2115 = vmatprep.subr.bf16.mxu0 %v2796_v33  ;;  %v1491_v60 = vpack.c.bf16 %v2238_v52, %v2238_v52 }
 0x605   :  { %1035 = vadd.xlane.f32.xlu0 %v1034_v49  ;;  %1489 = vadd.xlane.f32.xlu1 %v1488_v53 }
 0x609   :  { %703 = vadd.xlane.f32.xlu0 %v702_v55  ;;  %1160 = vadd.xlane.f32.xlu1 %v1159_v57 }
 0x60a   :  { %2106 = vmatmul.mubr.msk.bf16.vlgmr.msra.gmra.mrb[32].mxu0 %vm649_vm2, %v1381_v58 }
 0x60b   :  { %2116 = vmatpush3.bf16.msra.mxu0 %v1498_v59  ;;  %2117 = vmatprep.mubr.msk.bf16.mxu0 %vm2797_vm1, %v2796_v33 }
 0x60c   :  { %2129 = vmatprep.subr.bf16.mxu0 %v2796_v33 }
 0x612   :  { %2118 = vmatmul.mubr.msk.bf16.vlgmr.msra.gmra.mrb[36].mxu0 %vm649_vm2, %v1491_v60 }
 0x613   :  { %2133 = vmatprep.mubr.msk.bf16.mxu0 %vm2797_vm1, %v2796_v33 }
 0x615   :  { %v3412_v56 = vpop.f32.mrb[8].mxu0 }
 0x616   :  { %v2035_v61 = vpop.f32.mrb[9].mxu0 }
 0x617   :  { %v750_v62 = vpop.f32.mrb[10].mxu0 }
 0x618   :  { %v2036_v63 = vpop.f32.mrb[11].mxu0 }
 0x641   :  { %v815_v18 = vpop.xlane.xlu1 %814 }
 0x642   :  { %2239 = vrcp.f32 %v815_v18 }
 0x649   :  { %v926_v20 = vpop.xlane.xlu1 %925 }
 0x64c   :  { %v2240_v22 = vpop.eup %2239 }
 0x676   :  { %v1380_v21 = vpop.xlane.xlu1 %1379 }
 0x688   :  { %v860_v0 = vpop.f32.mrb[12].mxu0 }
 0x689   :  { %v2047_v1 = vpop.f32.mrb[13].mxu0  ;;  %v867_v25 = vmul.f32 %v2240_v22, %v860_v0 }
 0x68a   :  { %v863_v2 = vpop.f32.mrb[14].mxu0 }
 0x68b   :  { %v2048_v3 = vpop.f32.mrb[15].mxu0 }
 0x68e   :  { %v1270_v19 = vpop.xlane.xlu0 %1269 }
 0x68f   :  { %2241 = vrcp.f32 %v1270_v19 }
 0x690   :  { %v970_v4 = vpop.f32.mrb[16].mxu0  ;;  %2243 = vrcp.f32 %v926_v20 }
 0x691   :  { %v2059_v5 = vpop.f32.mrb[17].mxu0  ;;  %2245 = vrcp.f32 %v1380_v21 }
 0x692   :  { %v973_v6 = vpop.f32.mrb[18].mxu0  ;;  %v1036_v26 = vpop.xlane.xlu0 %1035 }
 0x693   :  { %v2060_v7 = vpop.f32.mrb[19].mxu0  ;;  %v1490_v31 = vpop.xlane.xlu1 %1489  ;;  %2247 = vrcp.f32 %v1036_v26 }
 0x694   :  { %2249 = vrcp.f32 %v1490_v31 }
 0x696   :  { %v704_v54 = vpop.xlane.xlu0 %703 }
 0x697   :  { %v1161_v55 = vpop.xlane.xlu1 %1160  ;;  %2251 = vrcp.f32 %v704_v54 }
 0x698   :  { %v1080_v8 = vpop.f32.mrb[20].mxu0  ;;  %2253 = vrcp.f32 %v1161_v55  ;;  %v2209_v55 = vld [vmem:[#allocation32 + $0x10] sm:$0xff]  }
 0x699   :  { %v2071_v9 = vpop.f32.mrb[21].mxu0  ;;  %v2242_v23 = vpop.eup %2241 }
 0x69a   :  { %v1083_v10 = vpop.f32.mrb[22].mxu0  ;;  %v2244_v35 = vpop.eup %2243 }
 0x69b   :  { %v2072_v11 = vpop.f32.mrb[23].mxu0  ;;  %v2246_v36 = vpop.eup %2245  ;;  %v977_v38 = vmul.f32 %v2244_v35, %v970_v4  ;;  %v2205_v35 = vld [vmem:[#allocation29] sm:$0xff]  }
 0x69c   :  { %2130 = vmatpush3.bf16.msra.mxu0 %v2205_v35  ;;  %v1948_v35 = vld [vmem:[#allocation16] ss:$0 sm:$0xff] }
 0x69d   :  { %v2248_v45 = vpop.eup %2247  ;;  %2131 = vmatprep.subr.bf16.mxu0 %v2796_v33 }
 0x69e   :  { %v2250_v46 = vpop.eup %2249  ;;  %v1087_v48 = vmul.f32 %v2248_v45, %v1080_v8 }
 0x6a0   :  { %v3414_v13 = vpop.f32.mrb[24].mxu0 }
 0x6a1   :  { %v2083_v15 = vpop.f32.mrb[25].mxu0  ;;  %v2252_v58 = vpop.eup %2251 }
 0x6a2   :  { %v1207_v16 = vpop.f32.mrb[26].mxu0  ;;  %v2254_v60 = vpop.eup %2253  ;;  %v754_v2 = vmul.f32 %v2252_v58, %v3412_v56  ;;  %v1931_v56 = vld [vmem:[#allocation28] ss:$0 sm:$0xff]  ;;  %v1937_v58 = vld [vmem:[#allocation31] ss:$0 sm:$0xff] }
 0x6a3   :  { %v2084_v17 = vpop.f32.mrb[27].mxu0  ;;  %v1211_v1 = vmul.f32 %v2254_v60, %v3414_v13 }
 0x6d5   :  { %v1314_v24 = vpop.f32.mrb[28].mxu0 }
 0x6d6   :  { %v1321_v27 = vmul.f32 %v2242_v23, %v1314_v24  ;;  %v2095_v28 = vpop.f32.mrb[29].mxu0 }
 0x6d7   :  { %v1317_v29 = vpop.f32.mrb[30].mxu0 }
 0x6d8   :  { %v2096_v32 = vpop.f32.mrb[31].mxu0  ;;  %v2182_v34 = vpack.i.bf16 %v1321_v27, %v867_v25 }
 0x6da   :  { %2183 = vrot.lane.b32.xlu0 %v2182_v34, %s3502_s19 }
 0x6dd   :  { %v1424_v37 = vpop.f32.mrb[32].mxu0 }
 0x6de   :  { %v1431_v39 = vmul.f32 %v2246_v36, %v1424_v37  ;;  %v2107_v40 = vpop.f32.mrb[33].mxu0  ;;  %v2207_v36 = vld [vmem:[#allocation32] sm:$0xff]   ;;  %v2208_v37 = vld [vmem:[#allocation32 + $0x8] sm:$0xff]  }
 0x6df   :  { %v1427_v42 = vpop.f32.mrb[34].mxu0 }
 0x6e0   :  { %v2187_v43 = vpack.i.bf16 %v1431_v39, %v977_v38  ;;  %v2108_v44 = vpop.f32.mrb[35].mxu0 }
 0x6e2   :  { %2188 = vrot.lane.b32.xlu1 %v2187_v43, %s2801_s15 }
 0x6e5   :  { %v1534_v47 = vpop.f32.mrb[36].mxu0 }
 0x6e6   :  { %v1541_v50 = vmul.f32 %v2250_v46, %v1534_v47  ;;  %v2119_v51 = vpop.f32.mrb[37].mxu0  ;;  %v1935_v46 = vld [vmem:[#allocation11] ss:$0 sm:$0xff] }
 0x6e7   :  { %v1537_v52 = vpop.f32.mrb[38].mxu0  ;;  %v1936_v51 = vld [vmem:[#allocation13] ss:$0 sm:$0xff] }
 0x6e8   :  { %v2192_v49 = vpack.i.bf16 %v1541_v50, %v1087_v48  ;;  %v2120_v53 = vpop.f32.mrb[39].mxu0 }
 0x6ea   :  { %2193 = vrot.lane.b32.xlu1 %v2192_v49, %s2802_s22 }
 0x74c   :  { %v2184_v57 = vpop.permute.xlu0 %2183 }
 0x74d   :  { %v2186_v61 = vunpack.i.h.bf16 %v2184_v57  ;;  %v2185_v62 = vunpack.i.l.bf16 %v2184_v57  ;;  %v2210_v57 = vld [vmem:[#allocation32 + $0x18] sm:$0xff]  }
 0x74f   :  { %v1554_v4 = vsel %vm649_vm2, %v1211_v1, %v2186_v61  ;;  %v1100_v5 = vsel %vm649_vm2, %v754_v2, %v2185_v62 }
 0x754   :  { %v2189_v59 = vpop.permute.xlu1 %2188 }
 0x755   :  { %v2191_v63 = vunpack.i.h.bf16 %v2189_v59  ;;  %v2190_v0 = vunpack.i.l.bf16 %v2189_v59 }
 0x757   :  { %v1555_v8 = vsel %vm1101_vm4, %v1554_v4, %v2191_v63  ;;  %v1102_v9 = vsel %vm1101_vm4, %v1100_v5, %v2190_v0  ;;  %v1941_v4 = vld [vmem:[#allocation34] ss:$0 sm:$0xff] }
 0x75c   :  { %v2194_v3 = vpop.permute.xlu1 %2193 }
 0x75d   :  { %v2196_v6 = vunpack.i.h.bf16 %v2194_v3  ;;  %v2195_v7 = vunpack.i.l.bf16 %v2194_v3 }
 0x75f   :  { %v1556_v10 = vsel %vm1103_vm5, %v1555_v8, %v2196_v6  ;;  %v1104_v11 = vsel %vm1103_vm5, %v1102_v9, %v2195_v7 }
 0x760   :  { %v1557_v15 = vpack.c.bf16 %v1556_v10, %v1104_v11 }
 0x762   :  { %2126 = vmatmul.mubr.msk.bf16.vlgmr.msra.gmra.mrb[36].mxu1 %vm334_vm0, %v1557_v15 }
 0x763   :  { %2145 = vmatprep.mubr.msk.bf16.mxu1 %vm2797_vm1, %v2796_v33  ;;  %2138 = vmatpush3.bf16.msra.mxu1 %v2207_v36 }
 0x764   :  { %2139 = vmatprep.subr.bf16.mxu1 %v2796_v33 }
 0x767   :  { %2140 = vmatpush3.bf16.msra.mxu1 %v2208_v37 }
 0x768   :  { %2141 = vmatprep.subr.bf16.mxu1 %v2796_v33 }
 0x76b   :  { %2142 = vmatpush3.bf16.msra.mxu1 %v2209_v55 }
 0x76c   :  { %2143 = vmatprep.subr.bf16.mxu1 %v2796_v33 }
 0x76f   :  { %2144 = vmatpush3.bf16.msra.mxu1 %v2210_v57 }
 0x835   :  { %v1618_v13 = vpop.f32.mrb[36].mxu1 }
 0x836   :  { %v1619_v16 = vadd.f32 %v1931_v56, %v1618_v13  ;;  %v2127_v17 = vpop.f32.mrb[37].mxu1 }
 0x837   :  { %v1621_v18 = vpop.f32.mrb[38].mxu1 }
 0x838   :  { %v1622_v19 = vadd.f32 %v1931_v56, %v1621_v18  ;;  %v2128_v20 = vpop.f32.mrb[39].mxu1  ;;  %v1625_v21 = vadd.f32 %v1619_v16, %v3243_v12 }
 0x83a   :  { %v1629_v22 = vsel %vm334_vm0, %v1625_v21, 0.0  ;;  %v1626_v23 = vadd.f32 %v1622_v19, %v3245_v14  ;;  %v2206_v14 = vld [vmem:[#allocation29 + $0x8] sm:$0xff]  }
 0x83b   :  { %1630 = vadd.xlane.f32.xlu1 %v1629_v22  ;;  %2132 = vmatpush3.bf16.msra.mxu0 %v2206_v14 }
 0x83c   :  { %v1632_v24 = vsel %vm334_vm0, %v1626_v23, 0.0 }
 0x83d   :  { %1633 = vadd.xlane.f32.xlu0 %v1632_v24 }
 0x8c8   :  { %v1631_v25 = vpop.xlane.xlu1 %1630 }
 0x8c9   :  { %v1635_v26 = vmul.f32 0.03125, %v1631_v25 }
 0x8ca   :  { %v1634_v27 = vpop.xlane.xlu0 %1633 }
 0x8cb   :  { %v1637_v28 = vsub.f32 %v1625_v21, %v1635_v26  ;;  %v1636_v29 = vmul.f32 0.03125, %v1634_v27 }
 0x8cd   :  { %v1638_v30 = vsub.f32 %v1626_v23, %v1636_v29  ;;  %v1639_v31 = vmul.f32 %v1637_v28, %v1637_v28 }
 0x8cf   :  { %v1641_v32 = vsel %vm334_vm0, %v1639_v31, 0.0  ;;  %v1640_v34 = vmul.f32 %v1638_v30, %v1638_v30 }
 0x8d0   :  { %1642 = vadd.xlane.f32.xlu0 %v1641_v32  ;;  %v1947_v32 = vld [vmem:[#allocation14] ss:$0 sm:$0xff] }
 0x8d1   :  { %v1644_v12 = vsel %vm334_vm0, %v1640_v34, 0.0 }
 0x8d4   :  { %1645 = vadd.xlane.f32.xlu0 %v1644_v12 }
 0x95d   :  { %v1643_v38 = vpop.xlane.xlu0 %1642 }
 0x95e   :  { %v1647_v39 = vmul.f32 0.03125, %v1643_v38 }
 0x960   :  { %v1649_v40 = vadd.f32 1e-05, %v1647_v39 }
 0x961   :  { %v1646_v41 = vpop.xlane.xlu0 %1645 }
 0x962   :  { %2255 = vrsqrt.f32 %v1649_v40  ;;  %v1648_v42 = vmul.f32 0.03125, %v1646_v41 }
 0x964   :  { %v1650_v43 = vadd.f32 1e-05, %v1648_v42 }
 0x966   :  { %2257 = vrsqrt.f32 %v1650_v43 }
 0x96c   :  { %v2256_v44 = vpop.eup %2255 }
 0x96d   :  { %v1653_v45 = vmul.f32 %v2256_v44, %v1637_v28 }
 0x96f   :  { %v1661_v48 = vmul.f32 %v1935_v46, %v1653_v45 }
 0x970   :  { %v2258_v47 = vpop.eup %2257 }
 0x971   :  { %v1654_v50 = vmul.f32 %v2258_v47, %v1638_v30  ;;  %v1669_v49 = vadd.f32 %v1936_v51, %v1661_v48 }
 0x973   :  { %v1662_v52 = vmul.f32 %v1935_v46, %v1654_v50 }
 0x975   :  { %v1670_v53 = vadd.f32 %v1936_v51, %v1662_v52 }
 0x977   :  { %v1671_v54 = vpack.c.bf16 %v1670_v53, %v1669_v49 }
 0x979   :  { %2134 = vmatmul.mubr.msk.bf16.vlgmr.msra.gmra.mrb[40].mxu0 %vm334_vm0, %v1671_v54 }
 0xa4c   :  { %v1732_v59 = vpop.f32.mrb[40].mxu0 }
 0xa4d   :  { %v1733_v60 = vadd.f32 %v1937_v58, %v1732_v59  ;;  %v2135_v61 = vpop.f32.mrb[41].mxu0 }
 0xa4e   :  { %v1735_v62 = vpop.f32.mrb[42].mxu0 }
 0xa4f   :  { %v1736_v63 = vadd.f32 %v1937_v58, %v1735_v62  ;;  %v2136_v0 = vpop.f32.mrb[43].mxu0  ;;  %v1739_v1 = vmax.f32 %v1733_v60, 0.0 }
 0xa51   :  { %v1740_v2 = vmax.f32 %v1736_v63, 0.0 }
 0xa53   :  { %v1741_v3 = vpack.c.bf16 %v1740_v2, %v1739_v1 }
 0xa55   :  { %2146 = vmatmul.mubr.msk.bf16.vlgmr.msra.gmra.mrb[40].mxu1 %vm1781_vm6, %v1741_v3 }
 0xb28   :  { %v1819_v5 = vpop.f32.mrb[40].mxu1 }
 0xb29   :  { %v1820_v6 = vadd.f32 %v1941_v4, %v1819_v5  ;;  %v2147_v7 = vpop.f32.mrb[41].mxu1 }
 0xb2a   :  { %v1822_v8 = vpop.f32.mrb[42].mxu1 }
 0xb2b   :  { %v1823_v33 = vadd.f32 %v1941_v4, %v1822_v8  ;;  %v2148_v9 = vpop.f32.mrb[43].mxu1  ;;  %v1826_v10 = vadd.f32 %v1820_v6, %v1669_v49 }
 0xb2d   :  { %v1830_v11 = vsel %vm334_vm0, %v1826_v10, 0.0  ;;  %v1827_v15 = vadd.f32 %v1823_v33, %v1670_v53 }
 0xb2e   :  { %1831 = vadd.xlane.f32.xlu1 %v1830_v11 }
 0xb2f   :  { %v1833_v56 = vsel %vm334_vm0, %v1827_v15, 0.0 }
 0xb30   :  { %1834 = vadd.xlane.f32.xlu0 %v1833_v56 }
 0xbbb   :  { %v1832_v13 = vpop.xlane.xlu1 %1831 }
 0xbbc   :  { %v1836_v16 = vmul.f32 0.03125, %v1832_v13 }
 0xbbd   :  { %v1835_v17 = vpop.xlane.xlu0 %1834 }
 0xbbe   :  { %v1838_v18 = vsub.f32 %v1826_v10, %v1836_v16  ;;  %v1837_v19 = vmul.f32 0.03125, %v1835_v17 }
 0xbc0   :  { %v1839_v20 = vsub.f32 %v1827_v15, %v1837_v19  ;;  %v1840_v21 = vmul.f32 %v1838_v18, %v1838_v18 }
 0xbc2   :  { %v1842_v22 = vsel %vm334_vm0, %v1840_v21, 0.0  ;;  %v1841_v23 = vmul.f32 %v1839_v20, %v1839_v20 }
 0xbc3   :  { %1843 = vadd.xlane.f32.xlu1 %v1842_v22 }
 0xbc4   :  { %v1845_v24 = vsel %vm334_vm0, %v1841_v23, 0.0 }
 0xbc5   :  { %1846 = vadd.xlane.f32.xlu0 %v1845_v24 }
 0xc50   :  { %v1844_v25 = vpop.xlane.xlu1 %1843 }
 0xc51   :  { %v1848_v26 = vmul.f32 0.03125, %v1844_v25 }
 0xc52   :  { %v1847_v27 = vpop.xlane.xlu0 %1846 }
 0xc53   :  { %v1850_v28 = vadd.f32 1e-05, %v1848_v26  ;;  %v1849_v29 = vmul.f32 0.03125, %v1847_v27 }
 0xc55   :  { %2259 = vrsqrt.f32 %v1850_v28  ;;  %v1851_v30 = vadd.f32 1e-05, %v1849_v29 }
 0xc57   :  { %2261 = vrsqrt.f32 %v1851_v30 }
 0xc5f   :  { %v2260_v31 = vpop.eup %2259 }
 0xc60   :  { %v1854_v34 = vmul.f32 %v2260_v31, %v1838_v18 }
 0xc61   :  { %v2262_v12 = vpop.eup %2261 }
 0xc62   :  { %v1855_v14 = vmul.f32 %v2262_v12, %v1839_v20  ;;  %v1862_v36 = vmul.f32 %v1947_v32, %v1854_v34 }
 0xc64   :  { %v1863_v37 = vmul.f32 %v1947_v32, %v1855_v14  ;;  %v1870_v38 = vadd.f32 %v1948_v35, %v1862_v36 }
 0xc66   :  { %v1871_v39 = vadd.f32 %v1948_v35, %v1863_v37  ;;  %1872 = vst.msk [vmem:[#allocation35] sm:$0xff] %vm334_vm0, %v1870_v38 }
 0xc68   :  { %1873 = vst.msk [vmem:[#allocation35 + $0x8] sm:$0xff] %vm334_vm0, %v1871_v39 }
 0xc69   :  { %2736 = shalt.err (!%p2733_p4)
}
 0xc6a   :  { %s3506_s8 = sld [smem:[#allocation54_spill]] }
 0xc70   :  { %s2737_s1 = scalar_lea.hbm %s3506_s8, 256 }
 0xc71   :  { %p2738_p5 = scmp.ne.s32.totalorder %s3506_s8, %s2737_s1  ;;  %p2741_p6 = scmp.lt.u32.totalorder %s2737_s1, %s3506_s8 }
 0xc73   :  { %p2743_p7 = pnand %p2741_p6, %p2738_p5 }
 0xc75   :  { %2746 = shalt.err (!%p2743_p7)
}
 0xc76   :  { %1885 = dma.vmem_to_hbm [thread:$0]  %s1880_s25, 256, %s3506_s8, [#allocation4], %s3503_s7, %s3503_s7, %s3502_s19  }
 0xc77   :  { %2769 = dma.done.wait [#allocation4], 256  }
 0xc78   :  { %2770 = vsyncadd [#allocation4], 4294967040 }
 0xc79   :  { %1889 = vsyncpa [#allocation3], 1 }
 0xc7a   :  { %1890 = vsyncpa [#allocation6], 1 }
 0xc7b   :  { %1891 = vsyncpa [#allocation9], 1 }
 0xc7c   :  { %1892 = vsyncpa [#allocation12], 1 }
 0xc7d   :  { %1893 = vsyncpa [#allocation15], 1 }
 0xc7e   :  { %1894 = vsyncpa [#allocation18], 1 }
 0xc7f   :  { %1895 = vsyncpa [#allocation21], 1 }
 0xc80   :  { %1896 = vsyncpa [#allocation24], 1 }
 0xc81   :  { %1897 = vsyncpa [#allocation27], 1 }
 0xc82   :  { %1898 = vsyncpa [#allocation30], 1 }
 0xc83   :  { %1899 = vsyncpa [#allocation33], 1 }
 0xc84   :  { %1900 = vsyncpa [#allocation4], 1 }

</bundles_post_ra>
